<compile_context>
chip_gen: v7x
topology: tpu7x:2x2x1
jax: 0.10.0
libtpu: 0.0.40
codegen_flags: <defaults>
</compile_context>

<pallas_src>
import math

import jax
import jax.numpy as jnp
from jax.experimental import pallas as pl
from jax.experimental.pallas import tpu as pltpu

# ---- tiny-BERT config (small shapes, consistent with the forward pass) ----
B = 2          # batch
S = 8          # sequence length
H = 32         # hidden size
NH = 2         # attention heads
DH = H // NH   # head dim
I = 64         # intermediate (FFN) size
VOCAB = 100
NTYPE = 2
NLAYERS = 2
LN_EPS = 1e-12

_GELU_C = math.sqrt(2.0 / math.pi)
_ATTN_SCALE = 1.0 / math.sqrt(DH)


# ----------------------------- fused Pallas kernel ------------------------------

def _layernorm(h, g, b):
    mu = jnp.mean(h, axis=-1, keepdims=True)
    var = jnp.mean(jnp.square(h - mu), axis=-1, keepdims=True)
    return (h - mu) * jax.lax.rsqrt(var + LN_EPS) * g + b


def _bert_encoder_kernel(emb_ref, mask_ref, eg_ref, eb_ref,
                         wqkv_ref, bqkv_ref, wo_ref, bo_ref,
                         ln1g_ref, ln1b_ref,
                         w1_ref, b1_ref, w2_ref, b2_ref,
                         ln2g_ref, ln2b_ref,
                         pw_ref, pb_ref,
                         out_ref, x_sc):
    """One grid step == one encoder layer; activation lives in VMEM scratch."""
    l = pl.program_id(0)

    # Layer 0: seed the resident activation with LayerNorm(embeddings)
    # (no zeros residual needed).
    @pl.when(l == 0)
    def _():
        x_sc[...] = _layernorm(emb_ref[...], eg_ref[...], eb_ref[...])

    x = x_sc[...]                       # (B*S, H)
    mask = mask_ref[...]                # (B, S) additive mask (0 / -10000)

    # ---- fused QKV projection: one matmul, (B*S, 3H) ----
    qkv = (jnp.dot(x, wqkv_ref[...], preferred_element_type=jnp.float32)
           + bqkv_ref[...])

    # ---- attention: all (batch, head) tiles inside this single grid step ----
    ctx_rows = []
    for b in range(B):
        q_b = qkv[b * S:(b + 1) * S, 0 * H:1 * H]          # (S, H)
        k_b = qkv[b * S:(b + 1) * S, 1 * H:2 * H]
        v_b = qkv[b * S:(b + 1) * S, 2 * H:3 * H]
        m_b = mask[b:b + 1, :]                              # (1, S)
        head_ctx = []
        for h in range(NH):
            qh = q_b[:, h * DH:(h + 1) * DH]                # (S, DH)
            kh = k_b[:, h * DH:(h + 1) * DH]
            vh = v_b[:, h * DH:(h + 1) * DH]
            s = jnp.dot(qh, kh.T,
                        preferred_element_type=jnp.float32) * _ATTN_SCALE
            s = s + m_b                                     # broadcast over rows
            s = s - jnp.max(s, axis=-1, keepdims=True)
            p = jnp.exp(s)
            p = p * pl.reciprocal(jnp.sum(p, axis=-1, keepdims=True),
                                  approx=True)
            head_ctx.append(jnp.dot(p, vh,
                                    preferred_element_type=jnp.float32))
        ctx_rows.append(jnp.concatenate(head_ctx, axis=-1))  # (S, H)
    ctx = jnp.concatenate(ctx_rows, axis=0)                  # (B*S, H)

    # ---- output projection + residual + LN1 ----
    attn_out = (jnp.dot(ctx, wo_ref[...], preferred_element_type=jnp.float32)
                + bo_ref[...])
    x = _layernorm(attn_out + x, ln1g_ref[...], ln1b_ref[...])

    # ---- FFN (GELU) + residual + LN2 ----
    hmid = (jnp.dot(x, w1_ref[...], preferred_element_type=jnp.float32)
            + b1_ref[...])
    # TODO(synk): HF BERT uses erf-based GELU; tanh approximation used here.
    hmid = 0.5 * hmid * (1.0 + jnp.tanh(
        _GELU_C * (hmid + 0.044715 * hmid * hmid * hmid)))
    ff = (jnp.dot(hmid, w2_ref[...], preferred_element_type=jnp.float32)
          + b2_ref[...])
    x = _layernorm(ff + x, ln2g_ref[...], ln2b_ref[...])

    x_sc[...] = x

    # Last layer: fused [CLS] pooler  pooled = tanh(cls @ W + b).
    @pl.when(l == pl.num_programs(0) - 1)
    def _():
        cls = jnp.concatenate([x[b * S:b * S + 1, :] for b in range(B)],
                              axis=0)                        # (B, H)
        out_ref[...] = jnp.tanh(
            jnp.dot(cls, pw_ref[...], preferred_element_type=jnp.float32)
            + pb_ref[...])


def _const_spec(shape):
    # Full-extent block, same block index every layer step -> fetched once.
    return pl.BlockSpec(shape, lambda l: (0,) * len(shape))


def _layer_spec(shape):
    # Per-layer block selected along the stacked leading layer axis.
    return pl.BlockSpec((None,) + shape, lambda l: (l,) + (0,) * len(shape))


# ------------------------------ model glue ---------------------------------

def init_params(key):
    def nrm(k, shape):
        return jax.random.normal(k, shape, jnp.float32) * 0.02

    keys = jax.random.split(key, 4 + NLAYERS)
    params = {
        "word_emb": nrm(keys[0], (VOCAB, H)),
        "pos_emb": nrm(keys[1], (S, H)),
        "type_emb": nrm(keys[2], (NTYPE, H)),
        "emb_ln_g": jnp.ones((H,), jnp.float32),
        "emb_ln_b": jnp.zeros((H,), jnp.float32),
        "pool_w": nrm(keys[3], (H, H)),
        "pool_b": jnp.zeros((H,), jnp.float32),
        "layers": [],
    }
    for li in range(NLAYERS):
        lk = jax.random.split(keys[4 + li], 6)
        params["layers"].append({
            "wq": nrm(lk[0], (H, H)), "bq": jnp.zeros((H,), jnp.float32),
            "wk": nrm(lk[1], (H, H)), "bk": jnp.zeros((H,), jnp.float32),
            "wv": nrm(lk[2], (H, H)), "bv": jnp.zeros((H,), jnp.float32),
            "wo": nrm(lk[3], (H, H)), "bo": jnp.zeros((H,), jnp.float32),
            "ln1_g": jnp.ones((H,), jnp.float32),
            "ln1_b": jnp.zeros((H,), jnp.float32),
            "w1": nrm(lk[4], (H, I)), "b1": jnp.zeros((I,), jnp.float32),
            "w2": nrm(lk[5], (I, H)), "b2": jnp.zeros((H,), jnp.float32),
            "ln2_g": jnp.ones((H,), jnp.float32),
            "ln2_b": jnp.zeros((H,), jnp.float32),
        })
    return params


@jax.jit
def bert_pool_out(params, input_ids, token_type_ids, attention_mask):
    """Equivalent of: _, y = bert(ids, token_type_ids, attention_mask); y.view(B, -1)."""
    Bn, Sn = input_ids.shape
    layers = params["layers"]

    # embeddings (gather glue stays in plain JAX)
    emb = (params["word_emb"][input_ids]
           + params["pos_emb"][jnp.arange(Sn)][None, :, :]
           + params["type_emb"][token_type_ids])
    emb = emb.reshape(Bn * Sn, H)

    # additive attention mask: 0 for keep, -10000 for pad   -> (B, S)
    addmask = (1.0 - attention_mask.astype(jnp.float32)) * -10000.0

    # stack per-layer weights along a leading layer axis; fuse wq|wk|wv.
    wqkv = jnp.stack([jnp.concatenate([l_["wq"], l_["wk"], l_["wv"]], axis=1)
                      for l_ in layers], axis=0)                     # (L, H, 3H)
    bqkv = jnp.stack([jnp.concatenate([l_["bq"], l_["bk"], l_["bv"]])[None, :]
                      for l_ in layers], axis=0)                     # (L, 1, 3H)
    wo = jnp.stack([l_["wo"] for l_ in layers], axis=0)              # (L, H, H)
    bo = jnp.stack([l_["bo"][None, :] for l_ in layers], axis=0)     # (L, 1, H)
    ln1g = jnp.stack([l_["ln1_g"][None, :] for l_ in layers], axis=0)
    ln1b = jnp.stack([l_["ln1_b"][None, :] for l_ in layers], axis=0)
    w1 = jnp.stack([l_["w1"] for l_ in layers], axis=0)              # (L, H, I)
    b1 = jnp.stack([l_["b1"][None, :] for l_ in layers], axis=0)     # (L, 1, I)
    w2 = jnp.stack([l_["w2"] for l_ in layers], axis=0)              # (L, I, H)
    b2 = jnp.stack([l_["b2"][None, :] for l_ in layers], axis=0)     # (L, 1, H)
    ln2g = jnp.stack([l_["ln2_g"][None, :] for l_ in layers], axis=0)
    ln2b = jnp.stack([l_["ln2_b"][None, :] for l_ in layers], axis=0)

    pooled = pl.pallas_call(
        _bert_encoder_kernel,
        out_shape=jax.ShapeDtypeStruct((Bn, H), jnp.float32),
        grid=(NLAYERS,),
        in_specs=[
            _const_spec((Bn * Sn, H)),                     # embeddings
            _const_spec((Bn, Sn)),                         # additive mask
            _const_spec((1, H)), _const_spec((1, H)),      # emb LN gamma / beta
            _layer_spec((H, 3 * H)), _layer_spec((1, 3 * H)),  # wqkv, bqkv
            _layer_spec((H, H)), _layer_spec((1, H)),          # wo, bo
            _layer_spec((1, H)), _layer_spec((1, H)),          # ln1 g/b
            _layer_spec((H, I)), _layer_spec((1, I)),          # w1, b1
            _layer_spec((I, H)), _layer_spec((1, H)),          # w2, b2
            _layer_spec((1, H)), _layer_spec((1, H)),          # ln2 g/b
            _const_spec((H, H)), _const_spec((1, H)),          # pooler w / b
        ],
        out_specs=pl.BlockSpec((Bn, H), lambda l: (0, 0)),
        scratch_shapes=[pltpu.VMEM((Bn * Sn, H), jnp.float32)],
        compiler_params=pltpu.CompilerParams(
            dimension_semantics=("arbitrary",)),   # layer axis carries state
    )(emb, addmask,
      params["emb_ln_g"][None, :], params["emb_ln_b"][None, :],
      wqkv, bqkv, wo, bo, ln1g, ln1b, w1, b1, w2, b2, ln2g, ln2b,
      params["pool_w"], params["pool_b"][None, :])

    return pooled.reshape(Bn, -1)                  # y.view(y.size()[0], -1)


# --------------------------------- main -------------------------------------

if __name__ == "__main__":
    root = jax.random.PRNGKey(0)
    pkey, ikey = jax.random.split(root)
    params = init_params(pkey)

    input_ids = jax.random.randint(ikey, (B, S), 0, VOCAB, dtype=jnp.int32)
    token_type_ids = jnp.concatenate(
        [jnp.zeros((B, S // 2), jnp.int32), jnp.ones((B, S - S // 2), jnp.int32)],
        axis=1)
    attention_mask = jnp.ones((B, S), jnp.int32).at[1, -2:].set(0)  # pad tail of ex 1

    y = bert_pool_out(params, input_ids, token_type_ids, attention_mask)
    y = jax.block_until_ready(y)

    # mimic the module's output packaging: [[guid, flat_pooled_vector], ...]
    guids = [f"guid_{i}" for i in range(B)]
    y_list = [list(map(float, row)) for row in jax.device_get(y)]
    result = {"output": [[g, y_list[i]] for i, g in enumerate(guids)]}

    assert y.shape == (B, H) and len(result["output"]) == B
    print("KERNEL_OK")
</pallas_src>

<mosaic_0001>
module attributes {stable_mosaic.version = 11 : i64} {
  func.func @_bert_encoder_kernel(%arg0: i32, %arg1: memref<16x32xf32, #tpu.memory_space<vmem>>, %arg2: memref<2x8xf32, #tpu.memory_space<vmem>>, %arg3: memref<1x32xf32, #tpu.memory_space<vmem>>, %arg4: memref<1x32xf32, #tpu.memory_space<vmem>>, %arg5: memref<1x32x96xf32, #tpu.memory_space<vmem>>, %arg6: memref<1x1x96xf32, #tpu.memory_space<vmem>>, %arg7: memref<1x32x32xf32, #tpu.memory_space<vmem>>, %arg8: memref<1x1x32xf32, #tpu.memory_space<vmem>>, %arg9: memref<1x1x32xf32, #tpu.memory_space<vmem>>, %arg10: memref<1x1x32xf32, #tpu.memory_space<vmem>>, %arg11: memref<1x32x64xf32, #tpu.memory_space<vmem>>, %arg12: memref<1x1x64xf32, #tpu.memory_space<vmem>>, %arg13: memref<1x64x32xf32, #tpu.memory_space<vmem>>, %arg14: memref<1x1x32xf32, #tpu.memory_space<vmem>>, %arg15: memref<1x1x32xf32, #tpu.memory_space<vmem>>, %arg16: memref<1x1x32xf32, #tpu.memory_space<vmem>>, %arg17: memref<32x32xf32, #tpu.memory_space<vmem>>, %arg18: memref<1x32xf32, #tpu.memory_space<vmem>>, %arg19: memref<2x32xf32, #tpu.memory_space<vmem>>, %arg20: memref<16x32xf32, #tpu.memory_space<vmem>>) attributes {dimension_semantics = [#tpu.dimension_semantics<arbitrary>], iteration_bounds = array<i64: 2>, scalar_prefetch = 0 : i64, scratch_operands = 1 : i64, tpu.core_type = #tpu.core_type<tc>, window_params = [{pipeline_mode = #tpu.pipeline_mode<synchronous>, transform_indices = @transform_0, window_bounds = array<i64: 16, 32>}, {pipeline_mode = #tpu.pipeline_mode<synchronous>, transform_indices = @transform_1, window_bounds = array<i64: 2, 8>}, {pipeline_mode = #tpu.pipeline_mode<synchronous>, transform_indices = @transform_2, window_bounds = array<i64: 1, 32>}, {pipeline_mode = #tpu.pipeline_mode<synchronous>, transform_indices = @transform_3, window_bounds = array<i64: 1, 32>}, {transform_indices = @transform_4, window_bounds = array<i64: 1, 32, 96>}, {transform_indices = @transform_5, window_bounds = array<i64: 1, 1, 96>}, {transform_indices = @transform_6, window_bounds = array<i64: 1, 32, 32>}, {transform_indices = @transform_7, window_bounds = array<i64: 1, 1, 32>}, {transform_indices = @transform_8, window_bounds = array<i64: 1, 1, 32>}, {transform_indices = @transform_9, window_bounds = array<i64: 1, 1, 32>}, {transform_indices = @transform_10, window_bounds = array<i64: 1, 32, 64>}, {transform_indices = @transform_11, window_bounds = array<i64: 1, 1, 64>}, {transform_indices = @transform_12, window_bounds = array<i64: 1, 64, 32>}, {transform_indices = @transform_13, window_bounds = array<i64: 1, 1, 32>}, {transform_indices = @transform_14, window_bounds = array<i64: 1, 1, 32>}, {transform_indices = @transform_15, window_bounds = array<i64: 1, 1, 32>}, {pipeline_mode = #tpu.pipeline_mode<synchronous>, transform_indices = @transform_16, window_bounds = array<i64: 32, 32>}, {pipeline_mode = #tpu.pipeline_mode<synchronous>, transform_indices = @transform_17, window_bounds = array<i64: 1, 32>}, {pipeline_mode = #tpu.pipeline_mode<synchronous>, transform_indices = @transform_18, window_bounds = array<i64: 2, 32>}]} {
    %c0_i32 = arith.constant 0 : i32
    %0 = arith.cmpi eq, %arg0, %c0_i32 : i32
    %1 = arith.extui %0 : i1 to i32
    %c0_i32_0 = arith.constant 0 : i32
    %2 = arith.cmpi ne, %1, %c0_i32_0 : i32
    scf.if %2 {
      %c0_80 = arith.constant 0 : index
      %c0_81 = arith.constant 0 : index
      %195 = vector.load %arg1[%c0_80, %c0_81] : memref<16x32xf32, #tpu.memory_space<vmem>>, vector<16x32xf32>
      %c0_82 = arith.constant 0 : index
      %c0_83 = arith.constant 0 : index
      %196 = vector.load %arg3[%c0_82, %c0_83] : memref<1x32xf32, #tpu.memory_space<vmem>>, vector<1x32xf32>
      %c0_84 = arith.constant 0 : index
      %c0_85 = arith.constant 0 : index
      %197 = vector.load %arg4[%c0_84, %c0_85] : memref<1x32xf32, #tpu.memory_space<vmem>>, vector<1x32xf32>
      %cst_86 = arith.constant dense<0.000000e+00> : vector<16xf32>
      %198 = vector.multi_reduction <add>, %195, %cst_86 [1] : vector<16x32xf32> to vector<16xf32>
      %199 = vector.shape_cast %198 : vector<16xf32> to vector<16x1xf32>
      %cst_87 = arith.constant 3.200000e+01 : f32
      %200 = vector.broadcast %cst_87 : f32 to vector<16x1xf32>
      %201 = arith.divf %199, %200 : vector<16x1xf32>
      %202 = vector.broadcast %201 : vector<16x1xf32> to vector<16x32xf32>
      %203 = arith.subf %195, %202 : vector<16x32xf32>
      %204 = arith.mulf %203, %203 : vector<16x32xf32>
      %cst_88 = arith.constant dense<0.000000e+00> : vector<16xf32>
      %205 = vector.multi_reduction <add>, %204, %cst_88 [1] : vector<16x32xf32> to vector<16xf32>
      %206 = vector.shape_cast %205 : vector<16xf32> to vector<16x1xf32>
      %cst_89 = arith.constant 3.200000e+01 : f32
      %207 = vector.broadcast %cst_89 : f32 to vector<16x1xf32>
      %208 = arith.divf %206, %207 : vector<16x1xf32>
      %209 = vector.broadcast %201 : vector<16x1xf32> to vector<16x32xf32>
      %210 = arith.subf %195, %209 : vector<16x32xf32>
      %cst_90 = arith.constant 9.99999996E-13 : f32
      %211 = vector.broadcast %cst_90 : f32 to vector<16x1xf32>
      %212 = arith.addf %208, %211 : vector<16x1xf32>
      %213 = math.rsqrt %212 : vector<16x1xf32>
      %214 = vector.broadcast %213 : vector<16x1xf32> to vector<16x32xf32>
      %215 = arith.mulf %210, %214 : vector<16x32xf32>
      %216 = vector.broadcast %196 : vector<1x32xf32> to vector<16x32xf32>
      %217 = arith.mulf %215, %216 : vector<16x32xf32>
      %218 = vector.broadcast %197 : vector<1x32xf32> to vector<16x32xf32>
      %219 = arith.addf %217, %218 : vector<16x32xf32>
      %c0_91 = arith.constant 0 : index
      %c0_92 = arith.constant 0 : index
      %220 = vector.load %arg20[%c0_91, %c0_92] : memref<16x32xf32, #tpu.memory_space<vmem>>, vector<16x32xf32>
      tpu.vector_store %arg20[%c0_91, %c0_92], %219 {strides = array<i32>} : memref<16x32xf32, #tpu.memory_space<vmem>>, vector<16x32xf32>,
    } else {
    }
    %c0 = arith.constant 0 : index
    %c0_1 = arith.constant 0 : index
    %3 = vector.load %arg20[%c0, %c0_1] : memref<16x32xf32, #tpu.memory_space<vmem>>, vector<16x32xf32>
    %c0_2 = arith.constant 0 : index
    %c0_3 = arith.constant 0 : index
    %4 = vector.load %arg2[%c0_2, %c0_3] : memref<2x8xf32, #tpu.memory_space<vmem>>, vector<2x8xf32>
    %c0_4 = arith.constant 0 : index
    %c0_5 = arith.constant 0 : index
    %c0_6 = arith.constant 0 : index
    %5 = vector.load %arg5[%c0_4, %c0_5, %c0_6] : memref<1x32x96xf32, #tpu.memory_space<vmem>>, vector<1x32x96xf32>
    %6 = vector.shape_cast %5 : vector<1x32x96xf32> to vector<32x96xf32>
    %cst = arith.constant dense<0.000000e+00> : vector<16x96xf32>
    %7 = tpu.matmul %3, %6, %cst {dimension_numbers = #tpu.dot_dimension_numbers<[1], [0], [0], [1], [0, 0, 1, 1], [], []>} : vector<16x32xf32>, vector<32x96xf32>, vector<16x96xf32> -> vector<16x96xf32>
    %c0_7 = arith.constant 0 : index
    %c0_8 = arith.constant 0 : index
    %c0_9 = arith.constant 0 : index
    %8 = vector.load %arg6[%c0_7, %c0_8, %c0_9] : memref<1x1x96xf32, #tpu.memory_space<vmem>>, vector<1x1x96xf32>
    %9 = vector.shape_cast %8 : vector<1x1x96xf32> to vector<1x96xf32>
    %10 = vector.broadcast %9 : vector<1x96xf32> to vector<16x96xf32>
    %11 = arith.addf %7, %10 : vector<16x96xf32>
    %12 = vector.extract_strided_slice %11 {offsets = [0, 0], sizes = [8, 32], strides = [1, 1]} : vector<16x96xf32> to vector<8x32xf32>
    %13 = vector.extract_strided_slice %11 {offsets = [0, 32], sizes = [8, 32], strides = [1, 1]} : vector<16x96xf32> to vector<8x32xf32>
    %14 = vector.extract_strided_slice %11 {offsets = [0, 64], sizes = [8, 32], strides = [1, 1]} : vector<16x96xf32> to vector<8x32xf32>
    %15 = vector.extract_strided_slice %4 {offsets = [0, 0], sizes = [1, 8], strides = [1, 1]} : vector<2x8xf32> to vector<1x8xf32>
    %16 = vector.extract_strided_slice %12 {offsets = [0, 0], sizes = [8, 16], strides = [1, 1]} : vector<8x32xf32> to vector<8x16xf32>
    %17 = vector.extract_strided_slice %13 {offsets = [0, 0], sizes = [8, 16], strides = [1, 1]} : vector<8x32xf32> to vector<8x16xf32>
    %18 = vector.extract_strided_slice %14 {offsets = [0, 0], sizes = [8, 16], strides = [1, 1]} : vector<8x32xf32> to vector<8x16xf32>
    %19 = tpu.transpose %17, [1, 0] : vector<8x16xf32> -> vector<16x8xf32>
    %cst_10 = arith.constant dense<0.000000e+00> : vector<8x8xf32>
    %20 = tpu.matmul %16, %19, %cst_10 {dimension_numbers = #tpu.dot_dimension_numbers<[1], [0], [0], [1], [0, 0, 1, 1], [], []>} : vector<8x16xf32>, vector<16x8xf32>, vector<8x8xf32> -> vector<8x8xf32>
    %cst_11 = arith.constant 2.500000e-01 : f32
    %21 = vector.broadcast %cst_11 : f32 to vector<8x8xf32>
    %22 = arith.mulf %20, %21 : vector<8x8xf32>
    %23 = vector.broadcast %15 : vector<1x8xf32> to vector<8x8xf32>
    %24 = arith.addf %22, %23 : vector<8x8xf32>
    %cst_12 = arith.constant dense<0xFF800000> : vector<8xf32>
    %25 = vector.multi_reduction <maximumf>, %24, %cst_12 [1] : vector<8x8xf32> to vector<8xf32>
    %26 = vector.shape_cast %25 : vector<8xf32> to vector<8x1xf32>
    %27 = vector.broadcast %26 : vector<8x1xf32> to vector<8x8xf32>
    %28 = arith.subf %24, %27 : vector<8x8xf32>
    %29 = math.exp %28 : vector<8x8xf32>
    %cst_13 = arith.constant dense<0.000000e+00> : vector<8xf32>
    %30 = vector.multi_reduction <add>, %29, %cst_13 [1] : vector<8x8xf32> to vector<8xf32>
    %31 = vector.shape_cast %30 : vector<8xf32> to vector<8x1xf32>
    %32 = tpu.reciprocal %31 {approx = true} : vector<8x1xf32> -> vector<8x1xf32>
    %33 = vector.broadcast %32 : vector<8x1xf32> to vector<8x8xf32>
    %34 = arith.mulf %29, %33 : vector<8x8xf32>
    %cst_14 = arith.constant dense<0.000000e+00> : vector<8x16xf32>
    %35 = tpu.matmul %34, %18, %cst_14 {dimension_numbers = #tpu.dot_dimension_numbers<[1], [0], [0], [1], [0, 0, 1, 1], [], []>} : vector<8x8xf32>, vector<8x16xf32>, vector<8x16xf32> -> vector<8x16xf32>
    %36 = vector.extract_strided_slice %12 {offsets = [0, 16], sizes = [8, 16], strides = [1, 1]} : vector<8x32xf32> to vector<8x16xf32>
    %37 = vector.extract_strided_slice %13 {offsets = [0, 16], sizes = [8, 16], strides = [1, 1]} : vector<8x32xf32> to vector<8x16xf32>
    %38 = vector.extract_strided_slice %14 {offsets = [0, 16], sizes = [8, 16], strides = [1, 1]} : vector<8x32xf32> to vector<8x16xf32>
    %39 = tpu.transpose %37, [1, 0] : vector<8x16xf32> -> vector<16x8xf32>
    %cst_15 = arith.constant dense<0.000000e+00> : vector<8x8xf32>
    %40 = tpu.matmul %36, %39, %cst_15 {dimension_numbers = #tpu.dot_dimension_numbers<[1], [0], [0], [1], [0, 0, 1, 1], [], []>} : vector<8x16xf32>, vector<16x8xf32>, vector<8x8xf32> -> vector<8x8xf32>
    %cst_16 = arith.constant 2.500000e-01 : f32
    %41 = vector.broadcast %cst_16 : f32 to vector<8x8xf32>
    %42 = arith.mulf %40, %41 : vector<8x8xf32>
    %43 = vector.broadcast %15 : vector<1x8xf32> to vector<8x8xf32>
    %44 = arith.addf %42, %43 : vector<8x8xf32>
    %cst_17 = arith.constant dense<0xFF800000> : vector<8xf32>
    %45 = vector.multi_reduction <maximumf>, %44, %cst_17 [1] : vector<8x8xf32> to vector<8xf32>
    %46 = vector.shape_cast %45 : vector<8xf32> to vector<8x1xf32>
    %47 = vector.broadcast %46 : vector<8x1xf32> to vector<8x8xf32>
    %48 = arith.subf %44, %47 : vector<8x8xf32>
    %49 = math.exp %48 : vector<8x8xf32>
    %cst_18 = arith.constant dense<0.000000e+00> : vector<8xf32>
    %50 = vector.multi_reduction <add>, %49, %cst_18 [1] : vector<8x8xf32> to vector<8xf32>
    %51 = vector.shape_cast %50 : vector<8xf32> to vector<8x1xf32>
    %52 = tpu.reciprocal %51 {approx = true} : vector<8x1xf32> -> vector<8x1xf32>
    %53 = vector.broadcast %52 : vector<8x1xf32> to vector<8x8xf32>
    %54 = arith.mulf %49, %53 : vector<8x8xf32>
    %cst_19 = arith.constant dense<0.000000e+00> : vector<8x16xf32>
    %55 = tpu.matmul %54, %38, %cst_19 {dimension_numbers = #tpu.dot_dimension_numbers<[1], [0], [0], [1], [0, 0, 1, 1], [], []>} : vector<8x8xf32>, vector<8x16xf32>, vector<8x16xf32> -> vector<8x16xf32>
    %56 = tpu.concatenate %35, %55 in 1 : vector<8x16xf32>, vector<8x16xf32> -> vector<8x32xf32>
    %57 = vector.extract_strided_slice %11 {offsets = [8, 0], sizes = [8, 32], strides = [1, 1]} : vector<16x96xf32> to vector<8x32xf32>
    %58 = vector.extract_strided_slice %11 {offsets = [8, 32], sizes = [8, 32], strides = [1, 1]} : vector<16x96xf32> to vector<8x32xf32>
    %59 = vector.extract_strided_slice %11 {offsets = [8, 64], sizes = [8, 32], strides = [1, 1]} : vector<16x96xf32> to vector<8x32xf32>
    %60 = vector.extract_strided_slice %4 {offsets = [1, 0], sizes = [1, 8], strides = [1, 1]} : vector<2x8xf32> to vector<1x8xf32>
    %61 = vector.extract_strided_slice %57 {offsets = [0, 0], sizes = [8, 16], strides = [1, 1]} : vector<8x32xf32> to vector<8x16xf32>
    %62 = vector.extract_strided_slice %58 {offsets = [0, 0], sizes = [8, 16], strides = [1, 1]} : vector<8x32xf32> to vector<8x16xf32>
    %63 = vector.extract_strided_slice %59 {offsets = [0, 0], sizes = [8, 16], strides = [1, 1]} : vector<8x32xf32> to vector<8x16xf32>
    %64 = tpu.transpose %62, [1, 0] : vector<8x16xf32> -> vector<16x8xf32>
    %cst_20 = arith.constant dense<0.000000e+00> : vector<8x8xf32>
    %65 = tpu.matmul %61, %64, %cst_20 {dimension_numbers = #tpu.dot_dimension_numbers<[1], [0], [0], [1], [0, 0, 1, 1], [], []>} : vector<8x16xf32>, vector<16x8xf32>, vector<8x8xf32> -> vector<8x8xf32>
    %cst_21 = arith.constant 2.500000e-01 : f32
    %66 = vector.broadcast %cst_21 : f32 to vector<8x8xf32>
    %67 = arith.mulf %65, %66 : vector<8x8xf32>
    %68 = vector.broadcast %60 : vector<1x8xf32> to vector<8x8xf32>
    %69 = arith.addf %67, %68 : vector<8x8xf32>
    %cst_22 = arith.constant dense<0xFF800000> : vector<8xf32>
    %70 = vector.multi_reduction <maximumf>, %69, %cst_22 [1] : vector<8x8xf32> to vector<8xf32>
    %71 = vector.shape_cast %70 : vector<8xf32> to vector<8x1xf32>
    %72 = vector.broadcast %71 : vector<8x1xf32> to vector<8x8xf32>
    %73 = arith.subf %69, %72 : vector<8x8xf32>
    %74 = math.exp %73 : vector<8x8xf32>
    %cst_23 = arith.constant dense<0.000000e+00> : vector<8xf32>
    %75 = vector.multi_reduction <add>, %74, %cst_23 [1] : vector<8x8xf32> to vector<8xf32>
    %76 = vector.shape_cast %75 : vector<8xf32> to vector<8x1xf32>
    %77 = tpu.reciprocal %76 {approx = true} : vector<8x1xf32> -> vector<8x1xf32>
    %78 = vector.broadcast %77 : vector<8x1xf32> to vector<8x8xf32>
    %79 = arith.mulf %74, %78 : vector<8x8xf32>
    %cst_24 = arith.constant dense<0.000000e+00> : vector<8x16xf32>
    %80 = tpu.matmul %79, %63, %cst_24 {dimension_numbers = #tpu.dot_dimension_numbers<[1], [0], [0], [1], [0, 0, 1, 1], [], []>} : vector<8x8xf32>, vector<8x16xf32>, vector<8x16xf32> -> vector<8x16xf32>
    %81 = vector.extract_strided_slice %57 {offsets = [0, 16], sizes = [8, 16], strides = [1, 1]} : vector<8x32xf32> to vector<8x16xf32>
    %82 = vector.extract_strided_slice %58 {offsets = [0, 16], sizes = [8, 16], strides = [1, 1]} : vector<8x32xf32> to vector<8x16xf32>
    %83 = vector.extract_strided_slice %59 {offsets = [0, 16], sizes = [8, 16], strides = [1, 1]} : vector<8x32xf32> to vector<8x16xf32>
    %84 = tpu.transpose %82, [1, 0] : vector<8x16xf32> -> vector<16x8xf32>
    %cst_25 = arith.constant dense<0.000000e+00> : vector<8x8xf32>
    %85 = tpu.matmul %81, %84, %cst_25 {dimension_numbers = #tpu.dot_dimension_numbers<[1], [0], [0], [1], [0, 0, 1, 1], [], []>} : vector<8x16xf32>, vector<16x8xf32>, vector<8x8xf32> -> vector<8x8xf32>
    %cst_26 = arith.constant 2.500000e-01 : f32
    %86 = vector.broadcast %cst_26 : f32 to vector<8x8xf32>
    %87 = arith.mulf %85, %86 : vector<8x8xf32>
    %88 = vector.broadcast %60 : vector<1x8xf32> to vector<8x8xf32>
    %89 = arith.addf %87, %88 : vector<8x8xf32>
    %cst_27 = arith.constant dense<0xFF800000> : vector<8xf32>
    %90 = vector.multi_reduction <maximumf>, %89, %cst_27 [1] : vector<8x8xf32> to vector<8xf32>
    %91 = vector.shape_cast %90 : vector<8xf32> to vector<8x1xf32>
    %92 = vector.broadcast %91 : vector<8x1xf32> to vector<8x8xf32>
    %93 = arith.subf %89, %92 : vector<8x8xf32>
    %94 = math.exp %93 : vector<8x8xf32>
    %cst_28 = arith.constant dense<0.000000e+00> : vector<8xf32>
    %95 = vector.multi_reduction <add>, %94, %cst_28 [1] : vector<8x8xf32> to vector<8xf32>
    %96 = vector.shape_cast %95 : vector<8xf32> to vector<8x1xf32>
    %97 = tpu.reciprocal %96 {approx = true} : vector<8x1xf32> -> vector<8x1xf32>
    %98 = vector.broadcast %97 : vector<8x1xf32> to vector<8x8xf32>
    %99 = arith.mulf %94, %98 : vector<8x8xf32>
    %cst_29 = arith.constant dense<0.000000e+00> : vector<8x16xf32>
    %100 = tpu.matmul %99, %83, %cst_29 {dimension_numbers = #tpu.dot_dimension_numbers<[1], [0], [0], [1], [0, 0, 1, 1], [], []>} : vector<8x8xf32>, vector<8x16xf32>, vector<8x16xf32> -> vector<8x16xf32>
    %101 = tpu.concatenate %80, %100 in 1 : vector<8x16xf32>, vector<8x16xf32> -> vector<8x32xf32>
    %102 = tpu.concatenate %56, %101 in 0 : vector<8x32xf32>, vector<8x32xf32> -> vector<16x32xf32>
    %c0_30 = arith.constant 0 : index
    %c0_31 = arith.constant 0 : index
    %c0_32 = arith.constant 0 : index
    %103 = vector.load %arg7[%c0_30, %c0_31, %c0_32] : memref<1x32x32xf32, #tpu.memory_space<vmem>>, vector<1x32x32xf32>
    %104 = vector.shape_cast %103 : vector<1x32x32xf32> to vector<32x32xf32>
    %cst_33 = arith.constant dense<0.000000e+00> : vector<16x32xf32>
    %105 = tpu.matmul %102, %104, %cst_33 {dimension_numbers = #tpu.dot_dimension_numbers<[1], [0], [0], [1], [0, 0, 1, 1], [], []>} : vector<16x32xf32>, vector<32x32xf32>, vector<16x32xf32> -> vector<16x32xf32>
    %c0_34 = arith.constant 0 : index
    %c0_35 = arith.constant 0 : index
    %c0_36 = arith.constant 0 : index
    %106 = vector.load %arg8[%c0_34, %c0_35, %c0_36] : memref<1x1x32xf32, #tpu.memory_space<vmem>>, vector<1x1x32xf32>
    %107 = vector.shape_cast %106 : vector<1x1x32xf32> to vector<1x32xf32>
    %108 = vector.broadcast %107 : vector<1x32xf32> to vector<16x32xf32>
    %109 = arith.addf %105, %108 : vector<16x32xf32>
    %110 = arith.addf %109, %3 : vector<16x32xf32>
    %c0_37 = arith.constant 0 : index
    %c0_38 = arith.constant 0 : index
    %c0_39 = arith.constant 0 : index
    %111 = vector.load %arg9[%c0_37, %c0_38, %c0_39] : memref<1x1x32xf32, #tpu.memory_space<vmem>>, vector<1x1x32xf32>
    %112 = vector.shape_cast %111 : vector<1x1x32xf32> to vector<1x32xf32>
    %c0_40 = arith.constant 0 : index
    %c0_41 = arith.constant 0 : index
    %c0_42 = arith.constant 0 : index
    %113 = vector.load %arg10[%c0_40, %c0_41, %c0_42] : memref<1x1x32xf32, #tpu.memory_space<vmem>>, vector<1x1x32xf32>
    %114 = vector.shape_cast %113 : vector<1x1x32xf32> to vector<1x32xf32>
    %cst_43 = arith.constant dense<0.000000e+00> : vector<16xf32>
    %115 = vector.multi_reduction <add>, %110, %cst_43 [1] : vector<16x32xf32> to vector<16xf32>
    %116 = vector.shape_cast %115 : vector<16xf32> to vector<16x1xf32>
    %cst_44 = arith.constant 3.200000e+01 : f32
    %117 = vector.broadcast %cst_44 : f32 to vector<16x1xf32>
    %118 = arith.divf %116, %117 : vector<16x1xf32>
    %119 = vector.broadcast %118 : vector<16x1xf32> to vector<16x32xf32>
    %120 = arith.subf %110, %119 : vector<16x32xf32>
    %121 = arith.mulf %120, %120 : vector<16x32xf32>
    %cst_45 = arith.constant dense<0.000000e+00> : vector<16xf32>
    %122 = vector.multi_reduction <add>, %121, %cst_45 [1] : vector<16x32xf32> to vector<16xf32>
    %123 = vector.shape_cast %122 : vector<16xf32> to vector<16x1xf32>
    %cst_46 = arith.constant 3.200000e+01 : f32
    %124 = vector.broadcast %cst_46 : f32 to vector<16x1xf32>
    %125 = arith.divf %123, %124 : vector<16x1xf32>
    %126 = vector.broadcast %118 : vector<16x1xf32> to vector<16x32xf32>
    %127 = arith.subf %110, %126 : vector<16x32xf32>
    %cst_47 = arith.constant 9.99999996E-13 : f32
    %128 = vector.broadcast %cst_47 : f32 to vector<16x1xf32>
    %129 = arith.addf %125, %128 : vector<16x1xf32>
    %130 = math.rsqrt %129 : vector<16x1xf32>
    %131 = vector.broadcast %130 : vector<16x1xf32> to vector<16x32xf32>
    %132 = arith.mulf %127, %131 : vector<16x32xf32>
    %133 = vector.broadcast %112 : vector<1x32xf32> to vector<16x32xf32>
    %134 = arith.mulf %132, %133 : vector<16x32xf32>
    %135 = vector.broadcast %114 : vector<1x32xf32> to vector<16x32xf32>
    %136 = arith.addf %134, %135 : vector<16x32xf32>
    %c0_48 = arith.constant 0 : index
    %c0_49 = arith.constant 0 : index
    %c0_50 = arith.constant 0 : index
    %137 = vector.load %arg11[%c0_48, %c0_49, %c0_50] : memref<1x32x64xf32, #tpu.memory_space<vmem>>, vector<1x32x64xf32>
    %138 = vector.shape_cast %137 : vector<1x32x64xf32> to vector<32x64xf32>
    %cst_51 = arith.constant dense<0.000000e+00> : vector<16x64xf32>
    %139 = tpu.matmul %136, %138, %cst_51 {dimension_numbers = #tpu.dot_dimension_numbers<[1], [0], [0], [1], [0, 0, 1, 1], [], []>} : vector<16x32xf32>, vector<32x64xf32>, vector<16x64xf32> -> vector<16x64xf32>
    %c0_52 = arith.constant 0 : index
    %c0_53 = arith.constant 0 : index
    %c0_54 = arith.constant 0 : index
    %140 = vector.load %arg12[%c0_52, %c0_53, %c0_54] : memref<1x1x64xf32, #tpu.memory_space<vmem>>, vector<1x1x64xf32>
    %141 = vector.shape_cast %140 : vector<1x1x64xf32> to vector<1x64xf32>
    %142 = vector.broadcast %141 : vector<1x64xf32> to vector<16x64xf32>
    %143 = arith.addf %139, %142 : vector<16x64xf32>
    %cst_55 = arith.constant 5.000000e-01 : f32
    %144 = vector.broadcast %cst_55 : f32 to vector<16x64xf32>
    %145 = arith.mulf %144, %143 : vector<16x64xf32>
    %cst_56 = arith.constant 4.471500e-02 : f32
    %146 = vector.broadcast %cst_56 : f32 to vector<16x64xf32>
    %147 = arith.mulf %146, %143 : vector<16x64xf32>
    %148 = arith.mulf %147, %143 : vector<16x64xf32>
    %149 = arith.mulf %148, %143 : vector<16x64xf32>
    %150 = arith.addf %143, %149 : vector<16x64xf32>
    %cst_57 = arith.constant 0.797884583 : f32
    %151 = vector.broadcast %cst_57 : f32 to vector<16x64xf32>
    %152 = arith.mulf %151, %150 : vector<16x64xf32>
    %153 = math.tanh %152 : vector<16x64xf32>
    %cst_58 = arith.constant 1.000000e+00 : f32
    %154 = vector.broadcast %cst_58 : f32 to vector<16x64xf32>
    %155 = arith.addf %154, %153 : vector<16x64xf32>
    %156 = arith.mulf %145, %155 : vector<16x64xf32>
    %c0_59 = arith.constant 0 : index
    %c0_60 = arith.constant 0 : index
    %c0_61 = arith.constant 0 : index
    %157 = vector.load %arg13[%c0_59, %c0_60, %c0_61] : memref<1x64x32xf32, #tpu.memory_space<vmem>>, vector<1x64x32xf32>
    %158 = vector.shape_cast %157 : vector<1x64x32xf32> to vector<64x32xf32>
    %cst_62 = arith.constant dense<0.000000e+00> : vector<16x32xf32>
    %159 = tpu.matmul %156, %158, %cst_62 {dimension_numbers = #tpu.dot_dimension_numbers<[1], [0], [0], [1], [0, 0, 1, 1], [], []>} : vector<16x64xf32>, vector<64x32xf32>, vector<16x32xf32> -> vector<16x32xf32>
    %c0_63 = arith.constant 0 : index
    %c0_64 = arith.constant 0 : index
    %c0_65 = arith.constant 0 : index
    %160 = vector.load %arg14[%c0_63, %c0_64, %c0_65] : memref<1x1x32xf32, #tpu.memory_space<vmem>>, vector<1x1x32xf32>
    %161 = vector.shape_cast %160 : vector<1x1x32xf32> to vector<1x32xf32>
    %162 = vector.broadcast %161 : vector<1x32xf32> to vector<16x32xf32>
    %163 = arith.addf %159, %162 : vector<16x32xf32>
    %164 = arith.addf %163, %136 : vector<16x32xf32>
    %c0_66 = arith.constant 0 : index
    %c0_67 = arith.constant 0 : index
    %c0_68 = arith.constant 0 : index
    %165 = vector.load %arg15[%c0_66, %c0_67, %c0_68] : memref<1x1x32xf32, #tpu.memory_space<vmem>>, vector<1x1x32xf32>
    %166 = vector.shape_cast %165 : vector<1x1x32xf32> to vector<1x32xf32>
    %c0_69 = arith.constant 0 : index
    %c0_70 = arith.constant 0 : index
    %c0_71 = arith.constant 0 : index
    %167 = vector.load %arg16[%c0_69, %c0_70, %c0_71] : memref<1x1x32xf32, #tpu.memory_space<vmem>>, vector<1x1x32xf32>
    %168 = vector.shape_cast %167 : vector<1x1x32xf32> to vector<1x32xf32>
    %cst_72 = arith.constant dense<0.000000e+00> : vector<16xf32>
    %169 = vector.multi_reduction <add>, %164, %cst_72 [1] : vector<16x32xf32> to vector<16xf32>
    %170 = vector.shape_cast %169 : vector<16xf32> to vector<16x1xf32>
    %cst_73 = arith.constant 3.200000e+01 : f32
    %171 = vector.broadcast %cst_73 : f32 to vector<16x1xf32>
    %172 = arith.divf %170, %171 : vector<16x1xf32>
    %173 = vector.broadcast %172 : vector<16x1xf32> to vector<16x32xf32>
    %174 = arith.subf %164, %173 : vector<16x32xf32>
    %175 = arith.mulf %174, %174 : vector<16x32xf32>
    %cst_74 = arith.constant dense<0.000000e+00> : vector<16xf32>
    %176 = vector.multi_reduction <add>, %175, %cst_74 [1] : vector<16x32xf32> to vector<16xf32>
    %177 = vector.shape_cast %176 : vector<16xf32> to vector<16x1xf32>
    %cst_75 = arith.constant 3.200000e+01 : f32
    %178 = vector.broadcast %cst_75 : f32 to vector<16x1xf32>
    %179 = arith.divf %177, %178 : vector<16x1xf32>
    %180 = vector.broadcast %172 : vector<16x1xf32> to vector<16x32xf32>
    %181 = arith.subf %164, %180 : vector<16x32xf32>
    %cst_76 = arith.constant 9.99999996E-13 : f32
    %182 = vector.broadcast %cst_76 : f32 to vector<16x1xf32>
    %183 = arith.addf %179, %182 : vector<16x1xf32>
    %184 = math.rsqrt %183 : vector<16x1xf32>
    %185 = vector.broadcast %184 : vector<16x1xf32> to vector<16x32xf32>
    %186 = arith.mulf %181, %185 : vector<16x32xf32>
    %187 = vector.broadcast %166 : vector<1x32xf32> to vector<16x32xf32>
    %188 = arith.mulf %186, %187 : vector<16x32xf32>
    %189 = vector.broadcast %168 : vector<1x32xf32> to vector<16x32xf32>
    %190 = arith.addf %188, %189 : vector<16x32xf32>
    %c0_77 = arith.constant 0 : index
    %c0_78 = arith.constant 0 : index
    %191 = vector.load %arg20[%c0_77, %c0_78] : memref<16x32xf32, #tpu.memory_space<vmem>>, vector<16x32xf32>
    tpu.vector_store %arg20[%c0_77, %c0_78], %190 {strides = array<i32>} : memref<16x32xf32, #tpu.memory_space<vmem>>, vector<16x32xf32>,
    %c1_i32 = arith.constant 1 : i32
    %192 = arith.cmpi eq, %arg0, %c1_i32 : i32
    %193 = arith.extui %192 : i1 to i32
    %c0_i32_79 = arith.constant 0 : i32
    %194 = arith.cmpi ne, %193, %c0_i32_79 : i32
    scf.if %194 {
      %195 = vector.extract_strided_slice %190 {offsets = [0, 0], sizes = [1, 32], strides = [1, 1]} : vector<16x32xf32> to vector<1x32xf32>
      %196 = vector.extract_strided_slice %190 {offsets = [8, 0], sizes = [1, 32], strides = [1, 1]} : vector<16x32xf32> to vector<1x32xf32>
      %197 = tpu.concatenate %195, %196 in 0 : vector<1x32xf32>, vector<1x32xf32> -> vector<2x32xf32>
      %c0_80 = arith.constant 0 : index
      %c0_81 = arith.constant 0 : index
      %198 = vector.load %arg17[%c0_80, %c0_81] : memref<32x32xf32, #tpu.memory_space<vmem>>, vector<32x32xf32>
      %cst_82 = arith.constant dense<0.000000e+00> : vector<2x32xf32>
      %199 = tpu.matmul %197, %198, %cst_82 {dimension_numbers = #tpu.dot_dimension_numbers<[1], [0], [0], [1], [0, 0, 1, 1], [], []>} : vector<2x32xf32>, vector<32x32xf32>, vector<2x32xf32> -> vector<2x32xf32>
      %c0_83 = arith.constant 0 : index
      %c0_84 = arith.constant 0 : index
      %200 = vector.load %arg18[%c0_83, %c0_84] : memref<1x32xf32, #tpu.memory_space<vmem>>, vector<1x32xf32>
      %201 = vector.broadcast %200 : vector<1x32xf32> to vector<2x32xf32>
      %202 = arith.addf %199, %201 : vector<2x32xf32>
      %203 = math.tanh %202 : vector<2x32xf32>
      %c0_85 = arith.constant 0 : index
      %c0_86 = arith.constant 0 : index
      %204 = vector.load %arg19[%c0_85, %c0_86] : memref<2x32xf32, #tpu.memory_space<vmem>>, vector<2x32xf32>
      tpu.vector_store %arg19[%c0_85, %c0_86], %203 {strides = array<i32>} : memref<2x32xf32, #tpu.memory_space<vmem>>, vector<2x32xf32>,
    } else {
    }
    return
  }
  func.func @transform_0(%arg0: i32) -> (i32, i32) {
    %c0_i32 = arith.constant 0 : i32
    %c0_i32_0 = arith.constant 0 : i32
    %c0_i32_1 = arith.constant 0 : i32
    return %c0_i32, %c0_i32_0 : i32, i32
  }
  func.func @transform_1(%arg0: i32) -> (i32, i32) {
    %c0_i32 = arith.constant 0 : i32
    %c0_i32_0 = arith.constant 0 : i32
    %c0_i32_1 = arith.constant 0 : i32
    return %c0_i32, %c0_i32_0 : i32, i32
  }
  func.func @transform_2(%arg0: i32) -> (i32, i32) {
    %c0_i32 = arith.constant 0 : i32
    %c0_i32_0 = arith.constant 0 : i32
    %c0_i32_1 = arith.constant 0 : i32
    return %c0_i32, %c0_i32_0 : i32, i32
  }
  func.func @transform_3(%arg0: i32) -> (i32, i32) {
    %c0_i32 = arith.constant 0 : i32
    %c0_i32_0 = arith.constant 0 : i32
    %c0_i32_1 = arith.constant 0 : i32
    return %c0_i32, %c0_i32_0 : i32, i32
  }
  func.func @transform_4(%arg0: i32) -> (i32, i32, i32) {
    %c0_i32 = arith.constant 0 : i32
    %c0_i32_0 = arith.constant 0 : i32
    %c0_i32_1 = arith.constant 0 : i32
    return %arg0, %c0_i32, %c0_i32_0 : i32, i32, i32
  }
  func.func @transform_5(%arg0: i32) -> (i32, i32, i32) {
    %c0_i32 = arith.constant 0 : i32
    %c0_i32_0 = arith.constant 0 : i32
    %c0_i32_1 = arith.constant 0 : i32
    return %arg0, %c0_i32, %c0_i32_0 : i32, i32, i32
  }
  func.func @transform_6(%arg0: i32) -> (i32, i32, i32) {
    %c0_i32 = arith.constant 0 : i32
    %c0_i32_0 = arith.constant 0 : i32
    %c0_i32_1 = arith.constant 0 : i32
    return %arg0, %c0_i32, %c0_i32_0 : i32, i32, i32
  }
  func.func @transform_7(%arg0: i32) -> (i32, i32, i32) {
    %c0_i32 = arith.constant 0 : i32
    %c0_i32_0 = arith.constant 0 : i32
    %c0_i32_1 = arith.constant 0 : i32
    return %arg0, %c0_i32, %c0_i32_0 : i32, i32, i32
  }
  func.func @transform_8(%arg0: i32) -> (i32, i32, i32) {
    %c0_i32 = arith.constant 0 : i32
    %c0_i32_0 = arith.constant 0 : i32
    %c0_i32_1 = arith.constant 0 : i32
    return %arg0, %c0_i32, %c0_i32_0 : i32, i32, i32
  }
  func.func @transform_9(%arg0: i32) -> (i32, i32, i32) {
    %c0_i32 = arith.constant 0 : i32
    %c0_i32_0 = arith.constant 0 : i32
    %c0_i32_1 = arith.constant 0 : i32
    return %arg0, %c0_i32, %c0_i32_0 : i32, i32, i32
  }
  func.func @transform_10(%arg0: i32) -> (i32, i32, i32) {
    %c0_i32 = arith.constant 0 : i32
    %c0_i32_0 = arith.constant 0 : i32
    %c0_i32_1 = arith.constant 0 : i32
    return %arg0, %c0_i32, %c0_i32_0 : i32, i32, i32
  }
  func.func @transform_11(%arg0: i32) -> (i32, i32, i32) {
    %c0_i32 = arith.constant 0 : i32
    %c0_i32_0 = arith.constant 0 : i32
    %c0_i32_1 = arith.constant 0 : i32
    return %arg0, %c0_i32, %c0_i32_0 : i32, i32, i32
  }
  func.func @transform_12(%arg0: i32) -> (i32, i32, i32) {
    %c0_i32 = arith.constant 0 : i32
    %c0_i32_0 = arith.constant 0 : i32
    %c0_i32_1 = arith.constant 0 : i32
    return %arg0, %c0_i32, %c0_i32_0 : i32, i32, i32
  }
  func.func @transform_13(%arg0: i32) -> (i32, i32, i32) {
    %c0_i32 = arith.constant 0 : i32
    %c0_i32_0 = arith.constant 0 : i32
    %c0_i32_1 = arith.constant 0 : i32
    return %arg0, %c0_i32, %c0_i32_0 : i32, i32, i32
  }
  func.func @transform_14(%arg0: i32) -> (i32, i32, i32) {
    %c0_i32 = arith.constant 0 : i32
    %c0_i32_0 = arith.constant 0 : i32
    %c0_i32_1 = arith.constant 0 : i32
    return %arg0, %c0_i32, %c0_i32_0 : i32, i32, i32
  }
  func.func @transform_15(%arg0: i32) -> (i32, i32, i32) {
    %c0_i32 = arith.constant 0 : i32
    %c0_i32_0 = arith.constant 0 : i32
    %c0_i32_1 = arith.constant 0 : i32
    return %arg0, %c0_i32, %c0_i32_0 : i32, i32, i32
  }
  func.func @transform_16(%arg0: i32) -> (i32, i32) {
    %c0_i32 = arith.constant 0 : i32
    %c0_i32_0 = arith.constant 0 : i32
    %c0_i32_1 = arith.constant 0 : i32
    return %c0_i32, %c0_i32_0 : i32, i32
  }
  func.func @transform_17(%arg0: i32) -> (i32, i32) {
    %c0_i32 = arith.constant 0 : i32
    %c0_i32_0 = arith.constant 0 : i32
    %c0_i32_1 = arith.constant 0 : i32
    return %c0_i32, %c0_i32_0 : i32, i32
  }
  func.func @transform_18(%arg0: i32) -> (i32, i32) {
    %c0_i32 = arith.constant 0 : i32
    %c0_i32_0 = arith.constant 0 : i32
    %c0_i32_1 = arith.constant 0 : i32
    return %c0_i32, %c0_i32_0 : i32, i32
  }
}

</mosaic_0001>

<bundles_post_ra>
// kernel: bert_pool_out.1
= control target key start
LH: loop header
LB: loop body
LE: loop exit
PB: predicated region body
PF: predicated region fallthrough
CT: control target
= control target key end

     0   :  { %s2952_s0 = inlined_call_operand.vmem [shape: f32[16,32], index: 0, kind: input, shape index: {}]   ;;  %s2953_s1 = inlined_call_operand.vmem [shape: f32[2,8], index: 1, kind: input, shape index: {}]   ;;  %s2954_s2 = inlined_call_operand.vmem [shape: f32[1,32], index: 2, kind: input, shape index: {}]   ;;  %s2955_s3 = inlined_call_operand.vmem [shape: f32[1,32], index: 3, kind: input, shape index: {}]   ;;  %s2956_s4 = inlined_call_operand.vmem [shape: f32[2,32,96], index: 4, kind: input, shape index: {}]   ;;  %s2957_s5 = inlined_call_operand.vmem [shape: f32[2,1,96], index: 5, kind: input, shape index: {}]   ;;  %s2958_s6 = inlined_call_operand.vmem [shape: f32[2,32,32], index: 6, kind: input, shape index: {}]   ;;  %s2959_s7 = inlined_call_operand.vmem [shape: f32[2,1,32], index: 7, kind: input, shape index: {}]   ;;  %s2960_s8 = inlined_call_operand.vmem [shape: f32[2,1,32], index: 8, kind: input, shape index: {}]   ;;  %s2961_s9 = inlined_call_operand.vmem [shape: f32[2,1,32], index: 9, kind: input, shape index: {}]   ;;  %s2962_s10 = inlined_call_operand.vmem [shape: f32[2,32,64], index: 10, kind: input, shape index: {}]   ;;  %s2963_s11 = inlined_call_operand.vmem [shape: f32[2,1,64], index: 11, kind: input, shape index: {}]   ;;  %s2964_s12 = inlined_call_operand.vmem [shape: f32[2,64,32], index: 12, kind: input, shape index: {}]   ;;  %s2965_s13 = inlined_call_operand.vmem [shape: f32[2,1,32], index: 13, kind: input, shape index: {}]   ;;  %s2966_s14 = inlined_call_operand.vmem [shape: f32[2,1,32], index: 14, kind: input, shape index: {}]   ;;  %s2967_s15 = inlined_call_operand.vmem [shape: f32[2,1,32], index: 15, kind: input, shape index: {}]   ;;  %s2968_s16 = inlined_call_operand.vmem [shape: f32[32,32], index: 16, kind: input, shape index: {}]   ;;  %s2969_s17 = inlined_call_operand.vmem [shape: f32[1,32], index: 17, kind: input, shape index: {}]   ;;  %s2970_s18 = inlined_call_operand.hbm [shape: f32[2,32], index: 18, kind: output, shape index: {}]  }
   0x1   :  { %2976 = sst [smem:[#allocation8_spill]] %s2952_s0 }
   0x2   :  { %2977 = sst [smem:[#allocation9_spill]] %s2953_s1 }
   0x3   :  { %2978 = sst [smem:[#allocation10_spill]] %s2954_s2 }
   0x4   :  { %2979 = sst [smem:[#allocation11_spill]] %s2956_s4 }
   0x5   :  { %2980 = sst [smem:[#allocation12_spill]] %s2958_s6 }
   0x6   :  { %2981 = sst [smem:[#allocation13_spill]] %s2968_s16 }
   0x7   :  { %2982 = sst [smem:[#allocation14_spill]] %s2969_s17 }
   0x8   :  { %2983 = sst [smem:[#allocation15_spill]] %s2970_s18 }
   0x9   :  { %23 = vsyncpa [#allocation4], 0  ;;  %s2671_s27 = smov 0  }
   0xa LB: > { %2984 = sst [smem:[#allocation6_spill]] %s2562_s27  ;;  %s2677_s28 = sadd.s32 4294967295, %s2562_s27   ;;  %s2562_s27 = sphi %s2671_s27, %s29_s27  }
   0xb   : > { %p2217_p0 = scmp.ge.s32.totalorder %s2562_s27, 1  ;;  %p602_p1 = scmp.lt.s32.totalorder %s2562_s27, 3 }
   0xd   : > { %p603_p2 = pnand %p2217_p0, %p602_p1 }
   0xf   : > { %606 = sbr.rel (%p603_p2) target bundleno = 3128 (0xc38), region = 92 }
  0x16   : > { %p690_p3 = scmp.lt.s32.totalorder %s2677_s28, 1  ;;  %s2985_s4 = sld [smem:[#allocation11_spill]] }
  0x17   : > { %s2986_s6 = sld [smem:[#allocation12_spill]]  ;;  %p2226_p4 = scmp.ne.s32.totalorder %s2677_s28, 0 }
  0x18   : > { %s2683_s29 = scalar_select %p690_p3, %s2677_s28, 1 }
  0x19   : > { %737 = sbr.rel (%p2226_p4) target bundleno = 350 (0x15e), region = 96  ;;  %s2988_s25 = sld [smem:[#allocation8_spill]] (!%p2226_p4)  ;;  %vm742_vm0 = vcmask (!%p2226_p4), 261120   ;;  %v2228_v23 = vld [vmem:[%s2955_s3] ss:$0 sm:$0xff] (!%p2226_p4) }
  0x1a   : > { %s2264_s30 = sshll.u32 %s2683_s29, 5  ;;  %s727_s0 = scalar_lea.vmem %s2965_s13, %s2683_s29 }
  0x1b   : > { %s730_s20 = scalar_lea.vmem %s2966_s14, %s2683_s29  ;;  %s733_s16 = scalar_lea.vmem %s2967_s15, %s2683_s29 }
  0x1c   : > { %s2693_s22 = scalar_lea.vmem %s2985_s4, %s2264_s30  ;;  %s2715_s4 = scalar_lea.vmem %s2962_s10, %s2264_s30 }
  0x1d   : > { %s2698_s24 = scalar_lea.vmem %s2986_s6, %s2264_s30  ;;  %s719_s6 = scalar_lea.vmem %s2963_s11, %s2683_s29 }
  0x1e   : > { %2987 = sst [smem:[#allocation7_spill]] %s2698_s24  ;;  %s2267_s24 = sshll.u32 %s2683_s29, 6 }
  0x1f   : > { %s2725_s27 = scalar_lea.vmem %s2964_s12, %s2267_s24  ;;  %v738_v0 = vld [vmem:[%s2988_s25] sm:$0xff] (!%p2226_p4)  ;;  %v739_v1 = vld [vmem:[%s2988_s25 + $0x8] sm:$0xff] (!%p2226_p4)  ;;  %s2989_s18 = sld [smem:[#allocation10_spill]] (!%p2226_p4) }
  0x20   : > { %v743_v2 = vsel %vm742_vm0, %v738_v0, 0.0  ;;  %v746_v3 = vsel %vm742_vm0, %v739_v1, 0.0 }
  0x21   : > { %744 = vadd.xlane.f32.xlu0 %v743_v2 }
  0x25   : > { %747 = vadd.xlane.f32.xlu0 %v746_v3  ;;  %v2227_v21 = vld [vmem:[%s2989_s18] ss:$0 sm:$0xff] }
  0xae   : > { %v745_v4 = vpop.xlane.xlu0 %744 }
  0xaf   : > { %v750_v5 = vmul.f32 0.03125, %v745_v4 }
  0xb1   : > { %v752_v6 = vsub.f32 %v738_v0, %v750_v5 }
  0xb2   : > { %v748_v7 = vpop.xlane.xlu0 %747 }
  0xb3   : > { %v751_v8 = vmul.f32 0.03125, %v748_v7  ;;  %v754_v9 = vmul.f32 %v752_v6, %v752_v6 }
  0xb5   : > { %v753_v10 = vsub.f32 %v739_v1, %v751_v8  ;;  %v756_v11 = vsel %vm742_vm0, %v754_v9, 0.0 }
  0xb6   : > { %757 = vadd.xlane.f32.xlu1 %v756_v11 }
  0xb7   : > { %v755_v12 = vmul.f32 %v753_v10, %v753_v10 }
  0xb9   : > { %v759_v13 = vsel %vm742_vm0, %v755_v12, 0.0 }
  0xba   : > { %760 = vadd.xlane.f32.xlu1 %v759_v13 }
 0x143   : > { %v758_v14 = vpop.xlane.xlu1 %757 }
 0x144   : > { %v762_v15 = vmul.f32 0.03125, %v758_v14 }
 0x146   : > { %v764_v16 = vadd.f32 1e-12, %v762_v15 }
 0x147   : > { %v761_v17 = vpop.xlane.xlu1 %760 }
 0x148   : > { %2492 = vrsqrt.f32 %v764_v16  ;;  %v763_v18 = vmul.f32 0.03125, %v761_v17 }
 0x14a   : > { %v765_v19 = vadd.f32 1e-12, %v763_v18 }
 0x14c   : > { %2494 = vrsqrt.f32 %v765_v19 }
 0x152   : > { %v2493_v20 = vpop.eup %2492 }
 0x153   : > { %v768_v22 = vmul.f32 %v2493_v20, %v752_v6 }
 0x155   : > { %v776_v24 = vmul.f32 %v2227_v21, %v768_v22 }
 0x156   : > { %v2495_v25 = vpop.eup %2494 }
 0x157   : > { %v784_v26 = vadd.f32 %v2228_v23, %v776_v24  ;;  %v769_v27 = vmul.f32 %v2495_v25, %v753_v10 }
 0x159   : > { %786 = vst.msk [vmem:[#allocation2] sm:$0xff] %vm742_vm0, %v784_v26  ;;  %v777_v28 = vmul.f32 %v2227_v21, %v769_v27 }
 0x15b   : > { %v785_v29 = vadd.f32 %v2228_v23, %v777_v28 }
 0x15d   : > { %787 = vst.msk [vmem:[#allocation2 + $0x8] sm:$0xff] %vm742_vm0, %v785_v29 }
 0x15e PF: > { %v791_v30 = vld [vmem:[%s2693_s22] sm:$0xff]  ;;  %v792_v31 = vld [vmem:[%s2693_s22 + $0x8] sm:$0xff]  ;;  %v793_v32 = vld [vmem:[%s2693_s22 + $0x10] sm:$0xff]  ;;  %vm802_vm1 = vcmask 261120   ;;  %v2564_v38 = vmov 0.0   ;;  %vm2565_vm2 = vmmov 0   ;;  %s2990_s2 = scalar_lea.vmem %s2957_s5, %s2683_s29  ;;  %v963_v50 = vlaneseq  ;;  %s2994_s17 = scalar_lea.vmem %s2960_s8, %s2683_s29 }
 0x15f   : > { %v2420_v33 = vpack.c.bf16 %v792_v31, %v791_v30  ;;  %v794_v34 = vld [vmem:[%s2693_s22 + $0x18] sm:$0xff]  ;;  %2338 = vmatprep.subr.mxu0 %v2564_v38  ;;  %2340 = vmatprep.mubr.msk.f32.mxu0 %vm2565_vm2, %v2564_v38  ;;  %v2229_v39 = vld [vmem:[%s2990_s2] ss:$0 sm:$0xff]  ;;  %s2566_s23 = smov 112   ;;  %s2567_s24 = smov 96   ;;  %vm887_vm3 = vcmask 130048  }
 0x160   : > { %v2762_v35 = vld [vmem:[#allocation2] sm:$0xff]  ;;  %v2424_v36 = vpack.c.bf16 %v794_v34, %v793_v32  ;;  %s2568_s26 = smov 80   ;;  %v964_v51 = vshrl.u32 %v963_v50, 7  ;;  %s2991_s18 = sld [smem:[#allocation9_spill]]  ;;  %vm968_vm4 = vcmask 64512   ;;  %vm1834_vm5 = vcmask 523264  }
 0x161   : > { %2325 = vmatprep.mubr.msk.f32.mxu1 %vm802_vm1, %v2762_v35  ;;  %2421 = vmatprep.subr.bf16.mxu1 %v2420_v33  ;;  %s2569_s19 = smov 64   ;;  %s2570_s30 = smov 48  }
 0x162   : > { %2423 = vmatpush3.bf16.msra.mxu1 %v2420_v33  ;;  %v965_v52 = vsub.s32 0, %v964_v51  ;;  %v1308_v59 = vsub.s32 1, %v964_v51  ;;  %s2992_s22 = sld [smem:[#allocation7_spill]]  ;;  %s2571_s21 = smov 16  }
 0x163   : > { %2425 = vmatprep.subr.bf16.mxu1 %v2424_v36  ;;  %p2257_p5 = scmp.ne.s32.totalorder %s2677_s28, 1 }
 0x164   : > { %v2766_v37 = vld [vmem:[#allocation2 + $0x8] sm:$0xff]  ;;  %vm2573_vm6 = vmmov (!%p2257_p5), 0   ;;  %vm1971_vm7 = vcmask (!%p2257_p5), 1040384   ;;  %vm2058_vm8 = vcmask (!%p2257_p5), 254976  }
 0x166   : > { %2427 = vmatpush3.bf16.msra.mxu1 %v2424_v36  ;;  %v790_v53 = vld [vmem:[%s2991_s18] sm:$0x3] }
 0x167   : > { %2328 = vmatprep.subr.mxu1 %v2564_v38  ;;  %v966_v54 = vrot.slane %v790_v53, %v965_v52  ;;  %v1309_v1 = vrot.slane %v790_v53, %v1308_v59 }
 0x168   : > { %v1570_v52 = vld [vmem:[%s2992_s22] sm:$0xff]  ;;  %v1571_v53 = vld [vmem:[%s2992_s22 + $0x8] sm:$0xff] }
 0x169   : > { %2326 = vmatmul.mubr.msk.f32.vlgmr.msra.gmra.mrb[0].mxu1 %vm802_vm1, %v2766_v37 }
 0x16a   : > { %2330 = vmatprep.mubr.msk.f32.mxu1 %vm2565_vm2, %v2564_v38 }
 0x23c   : > { %v2327_v40 = vpop.f32.mrb[0].mxu1 }
 0x23d   : > { %v875_v41 = vpop.f32.mrb[1].mxu1  ;;  %v2785_v43 = vadd.f32 %v2327_v40, %v2229_v39 }
 0x23e   : > { %v2781_v42 = vadd.f32 %v2229_v39, %v875_v41 }
 0x240   : > { %1056 = vrot.lane.b32.xlu1 %v2781_v42, %s2566_s23  ;;  %885 = vrot.lane.b32.xlu0 %v2781_v42, %s2567_s24 }
 0x244   : > { %1229 = vrot.lane.b32.xlu1 %v2785_v43, %s2567_s24  ;;  %1058 = vrot.lane.b32.xlu0 %v2781_v42, %s2568_s26  ;;  %s2993_s24 = scalar_lea.vmem %s2959_s7, %s2683_s29 }
 0x248   : > { %1398 = vrot.lane.b32.xlu1 %v2785_v43, %s2566_s23  ;;  %1400 = vrot.lane.b32.xlu0 %v2785_v43, %s2568_s26  ;;  %s2996_s26 = sld [smem:[#allocation13_spill]] (!%p2257_p5) }
 0x2b2   : > { %v886_v44 = vpop.permute.xlu0 %885  ;;  %v1057_v45 = vpop.permute.xlu1 %1056 }
 0x2b3   : > { %2329 = vmatpush3.xpose.msk.msra.mxu1 %vm887_vm3, %v886_v44 }
 0x2b4   : > { %2333 = vmatprep.subr.mxu1 %v2564_v38 }
 0x2b6   : > { %2331 = vmatmul.mubr.msk.f32.vlgmr.msra.gmra.mrb[2].mxu1 %vm887_vm3, %v2781_v42  ;;  %v1059_v46 = vpop.permute.xlu0 %1058  ;;  %v1230_v47 = vpop.permute.xlu1 %1229 }
 0x2b7   : > { %2339 = vmatpush3.xpose.msk.msra.mxu0 %vm887_vm3, %v1059_v46  ;;  %2335 = vmatprep.mubr.msk.f32.mxu1 %vm2565_vm2, %v2564_v38 }
 0x2b8   : > { %2348 = vmatprep.subr.mxu0 %v2564_v38 }
 0x2ba   : > { %2341 = vmatmul.mubr.msk.f32.vlgmr.msra.gmra.mrb[0].mxu0 %vm887_vm3, %v1057_v45  ;;  %v1401_v48 = vpop.permute.xlu0 %1400  ;;  %v1399_v49 = vpop.permute.xlu1 %1398 }
 0x2bb   : > { %2349 = vmatpush3.xpose.msk.msra.mxu0 %vm887_vm3, %v1230_v47  ;;  %2350 = vmatprep.mubr.msk.f32.mxu0 %vm2565_vm2, %v2564_v38 }
 0x2bc   : > { %2358 = vmatprep.subr.mxu0 %v2564_v38 }
 0x2be   : > { %2351 = vmatmul.mubr.msk.f32.vlgmr.msra.gmra.mrb[2].mxu0 %vm887_vm3, %v2785_v43 }
 0x2bf   : > { %2359 = vmatpush3.xpose.msk.msra.mxu0 %vm887_vm3, %v1401_v48  ;;  %2360 = vmatprep.mubr.msk.f32.mxu0 %vm2565_vm2, %v2564_v38 }
 0x2c2   : > { %2361 = vmatmul.mubr.msk.f32.vlgmr.msra.gmra.mrb[4].mxu0 %vm887_vm3, %v1399_v49 }
 0x389   : > { %v958_v55 = vpop.f32.mrb[2].mxu1 }
 0x38a   : > { %v962_v56 = vmul.f32 0.25, %v958_v55  ;;  %v2332_v57 = vpop.f32.mrb[3].mxu1  ;;  %v1572_v55 = vld [vmem:[%s2992_s22 + $0x10] sm:$0xff] }
 0x38c   : > { %v967_v58 = vadd.f32 %v966_v54, %v962_v56  ;;  %v1573_v56 = vld [vmem:[%s2992_s22 + $0x18] sm:$0xff]  ;;  %s2997_s22 = sld [smem:[#allocation14_spill]] (!%p2257_p5) }
 0x38d   : > { %v1130_v60 = vpop.f32.mrb[0].mxu0  ;;  %v2432_v57 = vpack.c.bf16 %v1573_v56, %v1572_v55  ;;  %v1825_v56 = vld [vmem:[%s2725_s27 + $0x30] sm:$0xff] }
 0x38e   : > { %v1134_v61 = vmul.f32 0.25, %v1130_v60  ;;  %v2342_v62 = vpop.f32.mrb[1].mxu0  ;;  %v969_v63 = vsel %vm968_vm4, %v967_v58, -inf }
 0x38f   : > { %970 = vmax.xlane.f32.xlu0 %v969_v63 }
 0x390   : > { %v1135_v0 = vadd.f32 %v1134_v61, %v966_v54  ;;  %v2428_v54 = vpack.c.bf16 %v1571_v53, %v1570_v52  ;;  %v1823_v53 = vld [vmem:[%s2725_s27 + $0x20] sm:$0xff] }
 0x391   : > { %v1301_v2 = vpop.f32.mrb[2].mxu0 }
 0x392   : > { %v1305_v3 = vmul.f32 0.25, %v1301_v2  ;;  %v2352_v4 = vpop.f32.mrb[3].mxu0  ;;  %v1136_v5 = vsel %vm968_vm4, %v1135_v0, -inf  ;;  %2429 = vmatprep.subr.bf16.mxu0 %v2428_v54 }
 0x393   : > { %1137 = vmax.xlane.f32.xlu1 %v1136_v5  ;;  %2431 = vmatpush3.bf16.msra.mxu0 %v2428_v54  ;;  %v2244_v5 = vld [vmem:[%s2993_s24] ss:$0 sm:$0xff]  ;;  %v1824_v54 = vld [vmem:[%s2725_s27 + $0x28] sm:$0xff] }
 0x394   : > { %v1310_v6 = vadd.f32 %v1309_v1, %v1305_v3  ;;  %2433 = vmatprep.subr.bf16.mxu0 %v2432_v57  ;;  %v2452_v55 = vpack.c.bf16 %v1824_v54, %v1823_v53  ;;  %v1973_v53 = vld [vmem:[%s2996_s26] sm:$0xff] (!%p2257_p5)  ;;  %v1974_v54 = vld [vmem:[%s2996_s26 + $0x8] sm:$0xff] (!%p2257_p5) }
 0x395   : > { %v1472_v7 = vpop.f32.mrb[4].mxu0 }
 0x396   : > { %v1476_v8 = vmul.f32 0.25, %v1472_v7  ;;  %v2362_v9 = vpop.f32.mrb[5].mxu0  ;;  %v1311_v10 = vsel %vm968_vm4, %v1310_v6, -inf }
 0x397   : > { %1312 = vmax.xlane.f32.xlu0 %v1311_v10  ;;  %2435 = vmatpush3.bf16.msra.mxu0 %v2432_v57  ;;  %v1826_v57 = vld [vmem:[%s2725_s27 + $0x38] sm:$0xff] }
 0x398   : > { %v1477_v11 = vadd.f32 %v1476_v8, %v1309_v1 }
 0x39a   : > { %v1478_v12 = vsel %vm968_vm4, %v1477_v11, -inf }
 0x39b   : > { %1479 = vmax.xlane.f32.xlu0 %v1478_v12 }
 0x3a4   : > { %980 = vrot.lane.b32.xlu1 %v2781_v42, %s2569_s19 }
 0x41c   : > { %v971_v13 = vpop.xlane.xlu0 %970 }
 0x41d   : > { %v972_v14 = vsub.f32 %v967_v58, %v971_v13 }
 0x41f   : > { %v973_v15 = vmul.f32 1.442695, %v972_v14 }
 0x420   : > { %v1138_v16 = vpop.xlane.xlu1 %1137 }
 0x421   : > { %2496 = vpow2.f32 %v973_v15  ;;  %v1139_v17 = vsub.f32 %v1135_v0, %v1138_v16 }
 0x423   : > { %v1140_v18 = vmul.f32 1.442695, %v1139_v17 }
 0x424   : > { %v981_v19 = vpop.permute.xlu1 %980  ;;  %v1313_v20 = vpop.xlane.xlu0 %1312 }
 0x425   : > { %2498 = vpow2.f32 %v1140_v18  ;;  %v1314_v21 = vsub.f32 %v1310_v6, %v1313_v20  ;;  %2334 = vmatpush3.msra.mxu1 %v981_v19 }
 0x426   : > { %2343 = vmatprep.subr.mxu1 %v2564_v38 }
 0x427   : > { %v1315_v22 = vmul.f32 1.442695, %v1314_v21 }
 0x428   : > { %v1480_v23 = vpop.xlane.xlu0 %1479 }
 0x429   : > { %2500 = vpow2.f32 %v1315_v22  ;;  %v1481_v24 = vsub.f32 %v1477_v11, %v1480_v23  ;;  %v1709_v22 = vld [vmem:[%s2715_s4] sm:$0xff]  ;;  %v1710_v23 = vld [vmem:[%s2715_s4 + $0x8] sm:$0xff] }
 0x42b   : > { %v2497_v25 = vpop.eup %2496  ;;  %v1482_v26 = vmul.f32 1.442695, %v1481_v24  ;;  %v2436_v24 = vpack.c.bf16 %v1710_v23, %v1709_v22 }
 0x42c   : > { %v975_v27 = vsel %vm968_vm4, %v2497_v25, 0.0 }
 0x42d   : > { %2502 = vpow2.f32 %v1482_v26  ;;  %976 = vadd.xlane.f32.xlu1 %v975_v27  ;;  %v1712_v26 = vld [vmem:[%s2715_s4 + $0x18] sm:$0xff] }
 0x42f   : > { %v2499_v28 = vpop.eup %2498 }
 0x430   : > { %v1142_v29 = vsel %vm968_vm4, %v2499_v28, 0.0 }
 0x431   : > { %1143 = vadd.xlane.f32.xlu0 %v1142_v29 }
 0x433   : > { %v2501_v30 = vpop.eup %2500 }
 0x434   : > { %v1317_v31 = vsel %vm968_vm4, %v2501_v30, 0.0 }
 0x435   : > { %1318 = vadd.xlane.f32.xlu1 %v1317_v31 }
 0x437   : > { %v2503_v32 = vpop.eup %2502 }
 0x438   : > { %v1484_v33 = vsel %vm968_vm4, %v2503_v32, 0.0 }
 0x439   : > { %1485 = vadd.xlane.f32.xlu0 %v1484_v33 }
 0x446   : > { %1322 = vrot.lane.b32.xlu1 %v2785_v43, %s2569_s19  ;;  %s2995_s19 = scalar_lea.vmem %s2961_s9, %s2683_s29 }
 0x44a   : > { %1489 = vrot.lane.b32.xlu1 %v2785_v43, %s2570_s30 }
 0x44f   : > { %1147 = vrot.lane.b32.xlu0 %v2781_v42, %s2570_s30 }
 0x4ba   : > { %v977_v34 = vpop.xlane.xlu1 %976 }
 0x4bb   : > { %2504 = vrcp.f32 %v977_v34 }
 0x4be   : > { %v1144_v36 = vpop.xlane.xlu0 %1143 }
 0x4bf   : > { %2506 = vrcp.f32 %v1144_v36  ;;  %v2247_v36 = vld [vmem:[%s2994_s17] ss:$0 sm:$0xff] }
 0x4c2   : > { %v1319_v39 = vpop.xlane.xlu1 %1318 }
 0x4c3   : > { %2508 = vrcp.f32 %v1319_v39 }
 0x4c5   : > { %v2505_v40 = vpop.eup %2504 }
 0x4c6   : > { %v979_v41 = vmul.f32 %v2505_v40, %v2497_v25  ;;  %v1486_v44 = vpop.xlane.xlu0 %1485  ;;  %v1323_v43 = vpop.permute.xlu1 %1322  ;;  %v1711_v25 = vld [vmem:[%s2715_s4 + $0x10] sm:$0xff]  ;;  %v2248_v40 = vld [vmem:[%s2995_s19] ss:$0 sm:$0xff] }
 0x4c7   : > { %2510 = vrcp.f32 %v1486_v44  ;;  %v2440_v27 = vpack.c.bf16 %v1712_v26, %v1711_v25 }
 0x4c8   : > { %2336 = vmatmul.mubr.msk.f32.vlgmr.msra.gmra.mrb[4].mxu1 %vm968_vm4, %v979_v41 }
 0x4c9   : > { %v2507_v45 = vpop.eup %2506  ;;  %2345 = vmatprep.mubr.msk.f32.mxu1 %vm2565_vm2, %v2564_v38 }
 0x4ca   : > { %v1146_v46 = vmul.f32 %v2507_v45, %v2499_v28  ;;  %v1148_v47 = vpop.permute.xlu0 %1147  ;;  %v1490_v49 = vpop.permute.xlu1 %1489 }
 0x4cb   : > { %2344 = vmatpush3.msra.mxu1 %v1148_v47 }
 0x4cc   : > { %2346 = vmatmul.mubr.msk.f32.vlgmr.msra.gmra.mrb[6].mxu1 %vm968_vm4, %v1146_v46  ;;  %2353 = vmatprep.subr.mxu1 %v2564_v38 }
 0x4cd   : > { %v2509_v42 = vpop.eup %2508  ;;  %2354 = vmatpush3.msra.mxu1 %v1323_v43  ;;  %2355 = vmatprep.mubr.msk.f32.mxu1 %vm2565_vm2, %v2564_v38 }
 0x4ce   : > { %v1321_v48 = vmul.f32 %v2509_v42, %v2501_v30  ;;  %2363 = vmatprep.subr.mxu1 %v2564_v38  ;;  %v1819_v42 = vld [vmem:[%s2725_s27] sm:$0xff] }
 0x4d0   : > { %2356 = vmatmul.mubr.msk.f32.vlgmr.msra.gmra.mrb[8].mxu1 %vm968_vm4, %v1321_v48  ;;  %v1820_v48 = vld [vmem:[%s2725_s27 + $0x8] sm:$0xff] }
 0x4d1   : > { %v2511_v50 = vpop.eup %2510  ;;  %2364 = vmatpush3.msra.mxu1 %v1490_v49  ;;  %2365 = vmatprep.mubr.msk.f32.mxu1 %vm2565_vm2, %v2564_v38  ;;  %v2444_v49 = vpack.c.bf16 %v1820_v48, %v1819_v42  ;;  %v2256_v42 = vld [vmem:[%s733_s16] ss:$0 sm:$0xff] }
 0x4d2   : > { %v1488_v51 = vmul.f32 %v2511_v50, %v2503_v32  ;;  %2437 = vmatprep.subr.bf16.mxu1 %v2436_v24  ;;  %v1821_v50 = vld [vmem:[%s2725_s27 + $0x10] sm:$0xff] }
 0x4d3   : > { %2445 = vmatprep.subr.bf16.mxu0 %v2444_v49 }
 0x4d4   : > { %2366 = vmatmul.mubr.msk.f32.vlgmr.msra.gmra.mrb[10].mxu1 %vm968_vm4, %v1488_v51  ;;  %v1822_v51 = vld [vmem:[%s2725_s27 + $0x18] sm:$0xff] }
 0x4d5   : > { %2439 = vmatpush3.bf16.msra.mxu1 %v2436_v24  ;;  %v2448_v52 = vpack.c.bf16 %v1822_v51, %v1821_v50 }
 0x4d6   : > { %2441 = vmatprep.subr.bf16.mxu1 %v2440_v27 }
 0x4d9   : > { %2443 = vmatpush3.bf16.msra.mxu1 %v2440_v27 }
 0x59b   : > { %v1052_v58 = vpop.f32.mrb[4].mxu1 }
 0x59c   : > { %v2337_v59 = vpop.f32.mrb[5].mxu1 }
 0x59d   : > { %v2249_v59 = vld [vmem:[%s719_s6] ss:$0 sm:$0xff] }
 0x59f   : > { %v1219_v60 = vpop.f32.mrb[6].mxu1 }
 0x5a0   : > { %1224 = vrot.lane.b32.xlu0 %v1219_v60, %s2571_s21  ;;  %v2347_v38 = vpop.f32.mrb[7].mxu1 }
 0x5a3   : > { %v1394_v61 = vpop.f32.mrb[8].mxu1 }
 0x5a4   : > { %v2357_v62 = vpop.f32.mrb[9].mxu1 }
 0x5a7   : > { %v1561_v63 = vpop.f32.mrb[10].mxu1 }
 0x5a8   : > { %1566 = vrot.lane.b32.xlu1 %v1561_v63, %s2571_s21  ;;  %v2367_v0 = vpop.f32.mrb[11].mxu1 }
 0x612   : > { %v1225_v1 = vpop.permute.xlu0 %1224 }
 0x613   : > { %v1227_v2 = vsel %vm887_vm3, %v1052_v58, %v1225_v1  ;;  %v2456_v58 = vpack.c.bf16 %v1826_v57, %v1825_v56  ;;  %v2572_v56 = vmov (!%p2257_p5), 0.0|0.0   ;;  %v2461_v57 = vpack.c.bf16 (!%p2257_p5), %v1974_v54, %v1973_v53 }
 0x614   : > { %2376 = vmatprep.mubr.msk.f32.mxu0 %vm802_vm1, %v1227_v2 }
 0x61a   : > { %v1567_v3 = vpop.permute.xlu1 %1566 }
 0x61b   : > { %v1569_v4 = vsel %vm887_vm3, %v1394_v61, %v1567_v3 }
 0x61c   : > { %2377 = vmatmul.mubr.msk.f32.vlgmr.msra.gmra.mrb[6].mxu0 %vm802_vm1, %v1569_v4 }
 0x61d   : > { %2447 = vmatpush3.bf16.msra.mxu0 %v2444_v49 }
 0x61e   : > { %2449 = vmatprep.subr.bf16.mxu0 %v2448_v52 }
 0x621   : > { %2451 = vmatpush3.bf16.msra.mxu0 %v2448_v52 }
 0x622   : > { %2453 = vmatprep.subr.bf16.mxu0 %v2452_v55 }
 0x625   : > { %2455 = vmatpush3.bf16.msra.mxu0 %v2452_v55  ;;  %v1975_v55 = vld [vmem:[%s2996_s26 + $0x10] sm:$0xff] (!%p2257_p5) }
 0x626   : > { %2457 = vmatprep.subr.bf16.mxu0 %v2456_v58 }
 0x629   : > { %2459 = vmatpush3.bf16.msra.mxu0 %v2456_v58  ;;  %v1976_v58 = vld [vmem:[%s2996_s26 + $0x18] sm:$0xff] (!%p2257_p5) }
 0x62a   : > { %2460 = vmatprep.subr.bf16.mxu0 (!%p2257_p5), %v2572_v56 }
 0x6ef   : > { %v2378_v6 = vpop.f32.mrb[6].mxu0 }
 0x6f0   : > { %v1659_v7 = vadd.f32 %v2378_v6, %v2244_v5  ;;  %v1653_v8 = vpop.f32.mrb[7].mxu0 }
 0x6f1   : > { %v1654_v9 = vadd.f32 %v2244_v5, %v1653_v8 }
 0x6f2   : > { %v1663_v10 = vadd.f32 %v1659_v7, %v2766_v37 }
 0x6f3   : > { %v1662_v11 = vadd.f32 %v1654_v9, %v2762_v35 }
 0x6f4   : > { %v1669_v12 = vsel %vm802_vm1, %v1663_v10, 0.0 }
 0x6f5   : > { %1670 = vadd.xlane.f32.xlu1 %v1669_v12  ;;  %v1666_v13 = vsel %vm802_vm1, %v1662_v11, 0.0 }
 0x6f6   : > { %1667 = vadd.xlane.f32.xlu0 %v1666_v13 }
 0x782   : > { %v1671_v14 = vpop.xlane.xlu1 %1670 }
 0x783   : > { %v1674_v15 = vmul.f32 0.03125, %v1671_v14  ;;  %v1668_v16 = vpop.xlane.xlu0 %1667 }
 0x784   : > { %v1673_v17 = vmul.f32 0.03125, %v1668_v16 }
 0x785   : > { %v1676_v18 = vsub.f32 %v1663_v10, %v1674_v15 }
 0x786   : > { %v1675_v19 = vsub.f32 %v1662_v11, %v1673_v17  ;;  %v2252_v17 = vld [vmem:[%s727_s0] ss:$0 sm:$0xff] }
 0x787   : > { %v1678_v35 = vmul.f32 %v1676_v18, %v1676_v18 }
 0x788   : > { %v1677_v20 = vmul.f32 %v1675_v19, %v1675_v19 }
 0x789   : > { %v1682_v21 = vsel %vm802_vm1, %v1678_v35, 0.0 }
 0x78a   : > { %v1679_v37 = vsel %vm802_vm1, %v1677_v20, 0.0 }
 0x78b   : > { %1680 = vadd.xlane.f32.xlu0 %v1679_v37 }
 0x78f   : > { %1683 = vadd.xlane.f32.xlu0 %v1682_v21 }
 0x818   : > { %v1681_v28 = vpop.xlane.xlu0 %1680 }
 0x819   : > { %v1685_v29 = vmul.f32 0.03125, %v1681_v28 }
 0x81b   : > { %v1687_v30 = vadd.f32 1e-12, %v1685_v29 }
 0x81c   : > { %v1684_v31 = vpop.xlane.xlu0 %1683 }
 0x81d   : > { %2512 = vrsqrt.f32 %v1687_v30  ;;  %v1686_v32 = vmul.f32 0.03125, %v1684_v31 }
 0x81f   : > { %v1688_v33 = vadd.f32 1e-12, %v1686_v32 }
 0x821   : > { %2514 = vrsqrt.f32 %v1688_v33 }
 0x827   : > { %v2513_v34 = vpop.eup %2512 }
 0x828   : > { %v1691_v39 = vmul.f32 %v2513_v34, %v1675_v19 }
 0x82a   : > { %v1699_v41 = vmul.f32 %v2247_v36, %v1691_v39 }
 0x82b   : > { %v2515_v44 = vpop.eup %2514 }
 0x82c   : > { %v1692_v45 = vmul.f32 %v2515_v44, %v1676_v18  ;;  %v1707_v46 = vadd.f32 %v2248_v40, %v1699_v41 }
 0x82e   : > { %v1700_v43 = vmul.f32 %v2247_v36, %v1692_v45  ;;  %2387 = vmatprep.mubr.msk.f32.mxu1 %vm802_vm1, %v1707_v46 }
 0x830   : > { %v1708_v47 = vadd.f32 %v2248_v40, %v1700_v43 }
 0x832   : > { %2388 = vmatmul.mubr.msk.f32.vlgmr.msra.gmra.mrb[12].mxu1 %vm802_vm1, %v1708_v47 }
 0x905   : > { %v2389_v60 = vpop.f32.mrb[12].mxu1 }
 0x906   : > { %v1798_v38 = vadd.f32 %v2389_v60, %v2249_v59  ;;  %v1792_v61 = vpop.f32.mrb[13].mxu1  ;;  %v2464_v60 = vpack.c.bf16 (!%p2257_p5), %v1976_v58, %v1975_v55 }
 0x907   : > { %v1793_v62 = vadd.f32 %v2249_v59, %v1792_v61  ;;  %v2574_v59 = vmov (!%p2257_p5), 0.0  }
 0x908   : > { %v1804_v63 = vmul.f32 0.044715, %v1798_v38  ;;  %v1802_v14 = vmul.f32 0.5, %v1798_v38 }
 0x909   : > { %v1803_v0 = vmul.f32 0.044715, %v1793_v62  ;;  %v1801_v12 = vmul.f32 0.5, %v1793_v62 }
 0x90a   : > { %v1806_v1 = vmul.f32 %v1804_v63, %v1798_v38 }
 0x90b   : > { %v1805_v2 = vmul.f32 %v1803_v0, %v1793_v62 }
 0x90c   : > { %v1808_v3 = vmul.f32 %v1806_v1, %v1798_v38 }
 0x90d   : > { %v1807_v4 = vmul.f32 %v1805_v2, %v1793_v62 }
 0x90e   : > { %v1810_v5 = vadd.f32 %v1808_v3, %v1798_v38 }
 0x90f   : > { %v1809_v6 = vadd.f32 %v1807_v4, %v1793_v62  ;;  %v2258_v62 = vld [vmem:[%s2997_s22] ss:$0 sm:$0xff] (!%p2257_p5) }
 0x910   : > { %v1812_v7 = vmul.f32 0.7978846, %v1810_v5 }
 0x911   : > { %v1811_v8 = vmul.f32 0.7978846, %v1809_v6 }
 0x912   : > { %2516 = vtanh.f32 %v1812_v7 }
 0x913   : > { %2518 = vtanh.f32 %v1811_v8 }
 0x91c   : > { %v2517_v9 = vpop.eup %2516 }
 0x91d   : > { %v2519_v10 = vpop.eup %2518  ;;  %v1816_v11 = vadd.f32 1.0, %v2517_v9 }
 0x91e   : > { %v1815_v13 = vadd.f32 1.0, %v2519_v10 }
 0x91f   : > { %v1818_v16 = vmul.f32 %v1816_v11, %v1802_v14 }
 0x920   : > { %v1817_v15 = vmul.f32 %v1815_v13, %v1801_v12 }
 0x922   : > { %2406 = vmatprep.mubr.msk.f32.mxu0 %vm1834_vm5, %v1817_v15 }
 0x923   : > { %2407 = vmatmul.mubr.msk.f32.vlgmr.msra.gmra.mrb[8].mxu0 %vm1834_vm5, %v1818_v16 }
 0x924   : > { %2417 = vmatprep.mubr.msk.f32.mxu0 (!%p2257_p5), %vm2573_vm6, %v2574_v59  ;;  %2462 = vmatpush3.bf16.msra.mxu0 (!%p2257_p5), %v2461_v57 }
 0x925   : > { %2463 = vmatprep.subr.bf16.mxu0 (!%p2257_p5), %v2572_v56 }
 0x928   : > { %2465 = vmatpush3.bf16.msra.mxu0 (!%p2257_p5), %v2464_v60 }
 0x9f6   : > { %v2408_v18 = vpop.f32.mrb[8].mxu0 }
 0x9f7   : > { %v1913_v19 = vadd.f32 %v2408_v18, %v2252_v17  ;;  %v1907_v20 = vpop.f32.mrb[9].mxu0 }
 0x9f8   : > { %v1908_v37 = vadd.f32 %v2252_v17, %v1907_v20 }
 0x9f9   : > { %v1917_v35 = vadd.f32 %v1913_v19, %v1708_v47 }
 0x9fa   : > { %v1916_v21 = vadd.f32 %v1908_v37, %v1707_v46  ;;  %v2255_v46 = vld [vmem:[%s730_s20] ss:$0 sm:$0xff] }
 0x9fb   : > { %v1923_v22 = vsel %vm802_vm1, %v1917_v35, 0.0 }
 0x9fc   : > { %1924 = vadd.xlane.f32.xlu0 %v1923_v22  ;;  %v1920_v23 = vsel %vm802_vm1, %v1916_v21, 0.0 }
 0x9fd   : > { %1921 = vadd.xlane.f32.xlu1 %v1920_v23 }
 0xa89   : > { %v1925_v24 = vpop.xlane.xlu0 %1924 }
 0xa8a   : > { %v1927_v25 = vmul.f32 0.03125, %v1925_v24  ;;  %v1922_v26 = vpop.xlane.xlu1 %1921 }
 0xa8b   : > { %v1926_v27 = vmul.f32 0.03125, %v1922_v26 }
 0xa8c   : > { %v1929_v28 = vsub.f32 %v1917_v35, %v1927_v25 }
 0xa8d   : > { %v1928_v29 = vsub.f32 %v1916_v21, %v1926_v27 }
 0xa8e   : > { %v1931_v30 = vmul.f32 %v1929_v28, %v1929_v28 }
 0xa8f   : > { %v1930_v31 = vmul.f32 %v1928_v29, %v1928_v29 }
 0xa90   : > { %v1935_v32 = vsel %vm802_vm1, %v1931_v30, 0.0 }
 0xa91   : > { %1936 = vadd.xlane.f32.xlu0 %v1935_v32  ;;  %v1932_v33 = vsel %vm802_vm1, %v1930_v31, 0.0 }
 0xa92   : > { %1933 = vadd.xlane.f32.xlu1 %v1932_v33 }
 0xb1e   : > { %v1937_v34 = vpop.xlane.xlu0 %1936 }
 0xb1f   : > { %v1939_v36 = vmul.f32 0.03125, %v1937_v34  ;;  %v1934_v39 = vpop.xlane.xlu1 %1933 }
 0xb20   : > { %v1938_v40 = vmul.f32 0.03125, %v1934_v39 }
 0xb21   : > { %v1941_v41 = vadd.f32 1e-12, %v1939_v36 }
 0xb22   : > { %v1940_v44 = vadd.f32 1e-12, %v1938_v40 }
 0xb23   : > { %2520 = vrsqrt.f32 %v1941_v41 }
 0xb24   : > { %2522 = vrsqrt.f32 %v1940_v44 }
 0xb2d   : > { %v2521_v45 = vpop.eup %2520 }
 0xb2e   : > { %v2523_v43 = vpop.eup %2522  ;;  %v1945_v47 = vmul.f32 %v2521_v45, %v1929_v28 }
 0xb2f   : > { %v1944_v48 = vmul.f32 %v2523_v43, %v1928_v29  ;;  %1967 = sbr.rel (%p2257_p5) target bundleno = 3097 (0xc19), region = 100 }
 0xb30   : > { %v1953_v49 = vmul.f32 %v2255_v46, %v1945_v47 }
 0xb31   : > { %v1952_v50 = vmul.f32 %v2255_v46, %v1944_v48 }
 0xb32   : > { %v1961_v51 = vadd.f32 %v2256_v42, %v1953_v49 }
 0xb33   : > { %v1960_v52 = vadd.f32 %v2256_v42, %v1952_v50 }
 0xb34   : > { %1963 = vst.msk [vmem:[#allocation2 + $0x8] sm:$0xff] %vm802_vm1, %v1961_v51  ;;  %v1969_v38 = vrot.slane (!%p2257_p5), %v1961_v51, 7 }
 0xb35   : > { %1962 = vst.msk [vmem:[#allocation2] sm:$0xff] %vm802_vm1, %v1960_v52 }
 0xb36   : > { %v1972_v61 = vsel %vm1971_vm7, %v1960_v52, %v1969_v38 }
 0xb37   : > { %2418 = vmatmul.mubr.msk.f32.vlgmr.msra.gmra.mrb[0].mxu0 %vm802_vm1, %v1972_v61 }
 0xc0a   : > { %v2053_v63 = vpop.f32.mrb[0].mxu0 }
 0xc0b   : > { %v2054_v0 = vadd.f32 %v2258_v62, %v2053_v63  ;;  %v2419_v1 = vpop.f32.mrb[1].mxu0 }
 0xc0d   : > { %2524 = vtanh.f32 %v2054_v0 }
 0xc17   : > { %v2525_v2 = vpop.eup %2524 }
 0xc18   : > { %2059 = vst.msk [vmem:[#allocation3] sm:$0x3] %vm2058_vm8, %v2525_v2 }
 0xc19 PF: > { %p2470_p6 = scmp.eq.s32.totalorder %s2677_s28, 1  ;;  %s2575_s6 = smov [#allocation3]  }
 0xc1a   : > { %s2067_s27 = sshll.u32 %s2575_s6, 4  ;;  %s2068_s27 = int_to_ptr.vmem [resolvable:$true] %s2067_s27 }
 0xc1b   : > { %s2526_s0 = scalar_lea.vmem %s2068_s27, 32  ;;  %p2533_p10 = scmp.lt.s32.totalorder %s2068_s27, %s2068_s27 }
 0xc1c   : > { %p2527_p7 = scmp.ne.s32.totalorder %s2068_s27, %s2526_s0  ;;  %p2534_p11 = scmp.lt.s32.totalorder %s2526_s0, %s2526_s0 }
 0xc1e   : > { %p2528_p8 = pnand %p2527_p7, %p2470_p6  ;;  %p2535_p12 = por %p2534_p11, %p2533_p10 }
 0xc20   : > { %p2529_p9 = pneg %p2528_p8 }
 0xc22   : > { %p2536_p13 = pnand %p2535_p12, %p2529_p9 }
 0xc24   : > { %2539 = shalt.err (!%p2536_p13)
}
 0xc25   : > { %s2998_s23 = sld [smem:[#allocation15_spill]] }
 0xc2b   : > { %s2540_s20 = scalar_lea.hbm %s2998_s23, 32 }
 0xc2c   : > { %p2541_p0 = scmp.ne.s32.totalorder %s2998_s23, %s2540_s20  ;;  %p2546_p3 = scmp.lt.u32.totalorder %s2540_s20, %s2998_s23 }
 0xc2e   : > { %p2542_p1 = pnand %p2541_p0, %p2470_p6 }
 0xc30   : > { %p2543_p2 = pneg %p2542_p1 }
 0xc32   : > { %p2548_p4 = pnand %p2546_p3, %p2543_p2 }
 0xc34   : > { %2551 = shalt.err (!%p2548_p4)
}
 0xc35   : > { %2467 = dma.vmem_to_hbm [thread:$0]  (%p2470_p6), %s2068_s27, 32, %s2998_s23, [#allocation4]  }
 0xc36   : > { %2557 = dma.done.wait (%p2470_p6), [#allocation4], 32  }
 0xc37   : > { %2559 = vsyncadd (%p2470_p6), [#allocation4], 4294967264 }
 0xc38 PF: > { %s2999_s18 = sld [smem:[#allocation6_spill]] }
 0xc3e   : > { %s29_s27 = sadd.s32 1, %s2999_s18  }
 0xc3f   : > { %p26_p5 = scmp.ge.s32.totalorder %s29_s27, 4  }
 0xc41   :  { %28 = sbr.rel (!%p26_p5) target bundleno = 10 (0xa), region = 160 }
 0xc48   :  { %2080 = vsyncpa [#allocation4], 1 }
 0xc49   :  { %2082 = vsyncpa [#allocation4 + $0x1], 1 }

</bundles_post_ra>
